<compile_context>
chip_gen: v6e
topology: v6e:2x2x1
jax: 0.10.0
libtpu: 0.0.40
codegen_flags: <defaults>
</compile_context>

<pallas_src>
import functools

import jax
import jax.numpy as jnp
from jax.experimental import pallas as pl
from jax.experimental.pallas import tpu as pltpu


def _detail_head_kernel(xm_ref, xu_ref, xd_ref, w3_ref, bias_ref, w1_ref,
                        b1_ref, o_ref, xt_ref):
    # xm_ref  : (1, C, TH, W)  VMEM   main row-tile of the input
    # xu_ref  : (1, C, 8,  W)  VMEM   8 rows ending just above the tile (clamped)
    # xd_ref  : (1, C, 8,  W)  VMEM   8 rows starting just below the tile (clamped)
    # w3_ref  : (C*C*9,)       SMEM   3x3 conv weights with BN scale folded in
    # bias_ref: (C,)           SMEM   folded BN bias
    # w1_ref  : (C,)           SMEM   1x1 classifier weights
    # b1_ref  : (1,)           SMEM   classifier bias
    # o_ref   : (1, TH, W)     VMEM   single-channel output tile (W in lanes)
    # xt_ref  : (C, TH+2, W+2) VMEM   scratch: zero-padded tile with 1-px halo
    _, C, TH, W = xm_ref.shape
    i = pl.program_id(1)
    nh = pl.num_programs(1)

    # ---- stage the tile (+ halo rows) into the zero-padded scratch ----------
    xt_ref[...] = jnp.zeros_like(xt_ref)
    xt_ref[:, 1:TH + 1, 1:W + 1] = xm_ref[0]
    top_ok = (i > 0).astype(jnp.float32)          # halo row exists above?
    bot_ok = (i < nh - 1).astype(jnp.float32)     # halo row exists below?
    xt_ref[:, 0, 1:W + 1] = xu_ref[0, :, 7, :] * top_ok
    xt_ref[:, TH + 1, 1:W + 1] = xd_ref[0, :, 0, :] * bot_ok

    # ---- fused 3x3 conv (BN folded) -> ReLU -> 1x1 classifier, all on VPU ---
    accs = [jnp.full((TH, W), bias_ref[c], jnp.float32) for c in range(C)]
    for ci in range(C):
        for ky in range(3):
            for kx in range(3):
                # shifted (TH, W) window; loaded once, reused for all C outputs
                patch = xt_ref[ci, ky:ky + TH, kx:kx + W]
                for c in range(C):
                    w = w3_ref[((c * C + ci) * 3 + ky) * 3 + kx]
                    accs[c] = accs[c] + w * patch

    out = jnp.full((TH, W), b1_ref[0], jnp.float32)
    for c in range(C):
        out = out + w1_ref[c] * jnp.maximum(accs[c], 0.0)
    o_ref[0] = out.astype(o_ref.dtype)


@functools.partial(jax.jit, static_argnames=("eps", "row_tile"))
def detail_head_forward(x, w3, gamma, beta, run_mean, run_var, w1, b1,
                        eps=1e-5, row_tile=None):
    """x: (N, C, H, W) float32.  Returns (N, 1, H, W) float32."""
    N, C, H, W = x.shape
    th = row_tile if row_tile is not None else min(H, 256)
    hblk = 8  # halo block height (sublane-aligned)
    if th % hblk or H % th or H % hblk:
        raise ValueError("H and row_tile must be multiples of 8, and row_tile "
                         f"must divide H (got H={H}, row_tile={th}).")
    nh = H // th

    # ---- parameter folding (plain JAX, tiny) --------------------------------
    scale = gamma / jnp.sqrt(run_var + eps)                      # (C,)
    w3f = (w3 * scale[:, None, None, None]).reshape(-1)          # (C*C*9,)
    biasf = beta - run_mean * scale                              # (C,)
    w1f = w1.reshape(-1)                                         # (C,)
    b1f = b1.reshape(-1)                                         # (1,)

    smem = pl.BlockSpec(memory_space=pltpu.MemorySpace.SMEM)

    out_hw = pl.pallas_call(
        _detail_head_kernel,
        out_shape=jax.ShapeDtypeStruct((N, H, W), jnp.float32),
        grid=(N, nh),
        in_specs=[
            # main row tile
            pl.BlockSpec((1, C, th, W), lambda n, i: (n, 0, i, 0)),
            # 8 rows ending just above the tile (clamped at the top border)
            pl.BlockSpec((1, C, hblk, W),
                         lambda n, i: (n, 0,
                                       jnp.maximum(i * (th // hblk) - 1, 0), 0)),
            # 8 rows starting just below the tile (clamped at the bottom border)
            pl.BlockSpec((1, C, hblk, W),
                         lambda n, i: (n, 0,
                                       jnp.minimum((i + 1) * (th // hblk),
                                                   H // hblk - 1), 0)),
            smem, smem, smem, smem,
        ],
        out_specs=pl.BlockSpec((1, th, W), lambda n, i: (n, i, 0)),
        scratch_shapes=[pltpu.VMEM((C, th + 2, W + 2), jnp.float32)],
        compiler_params=pltpu.CompilerParams(
            dimension_semantics=("parallel", "parallel")),
    )(x, x, x, w3f, biasf, w1f, b1f)

    return out_hw[:, None, :, :]                                 # (N, 1, H, W)


def _reference(x, w3, gamma, beta, run_mean, run_var, w1, b1, eps=1e-5):
    """Pure-JAX reference matching PyTorch semantics (NCHW)."""
    hi = jax.lax.Precision.HIGHEST
    y = jax.lax.conv_general_dilated(
        x, w3, window_strides=(1, 1), padding=((1, 1), (1, 1)),
        dimension_numbers=("NCHW", "OIHW", "NCHW"), precision=hi)
    scale = gamma / jnp.sqrt(run_var + eps)
    bias = beta - run_mean * scale
    y = y * scale[None, :, None, None] + bias[None, :, None, None]
    y = jnp.maximum(y, 0.0)
    out = jax.lax.conv_general_dilated(
        y, w1, window_strides=(1, 1), padding=((0, 0), (0, 0)),
        dimension_numbers=("NCHW", "OIHW", "NCHW"), precision=hi)
    return out + b1[None, :, None, None]


if __name__ == "__main__":
    key = jax.random.PRNGKey(0)
    N, C, H, W = 2, 4, 16, 16                                    # in_chs = 4

    k = jax.random.split(key, 8)
    x = jax.random.normal(k[0], (N, C, H, W), jnp.float32)

    # Conv3x3_BN_ReLU(in_chs, in_chs): conv weight (C, C, 3, 3), no bias; BN(C).
    w3 = jax.random.normal(k[1], (C, C, 3, 3), jnp.float32) * 0.1
    gamma = 1.0 + 0.1 * jax.random.normal(k[2], (C,), jnp.float32)
    beta = 0.1 * jax.random.normal(k[3], (C,), jnp.float32)
    run_mean = 0.1 * jax.random.normal(k[4], (C,), jnp.float32)
    run_var = jnp.abs(jax.random.normal(k[5], (C,), jnp.float32)) + 0.5

    # Classifier(in_chs, 1): 1x1 conv weight (1, C, 1, 1) + bias (1,).
    w1 = jax.random.normal(k[6], (1, C, 1, 1), jnp.float32) * 0.1
    b1 = 0.1 * jax.random.normal(k[7], (1,), jnp.float32)

    # row_tile=8 -> 2 row-tiles per image, so the interior-halo path is tested.
    out = detail_head_forward(x, w3, gamma, beta, run_mean, run_var, w1, b1,
                              row_tile=8)
    out = jax.block_until_ready(out)

    ref = _reference(x, w3, gamma, beta, run_mean, run_var, w1, b1)
    assert out.shape == (N, 1, H, W), out.shape
    assert jnp.allclose(out, ref, atol=1e-4, rtol=1e-4), (
        float(jnp.max(jnp.abs(out - ref))))

    print("KERNEL_OK")
</pallas_src>

<mosaic_0001>
module attributes {stable_mosaic.version = 11 : i64} {
  func.func @_detail_head_kernel(%arg0: i32, %arg1: i32, %arg2: memref<1x4x8x16xf32, #tpu.memory_space<vmem>>, %arg3: memref<1x4x8x16xf32, #tpu.memory_space<vmem>>, %arg4: memref<1x4x8x16xf32, #tpu.memory_space<vmem>>, %arg5: memref<144xf32, #tpu.memory_space<smem>>, %arg6: memref<4xf32, #tpu.memory_space<smem>>, %arg7: memref<4xf32, #tpu.memory_space<smem>>, %arg8: memref<1xf32, #tpu.memory_space<smem>>, %arg9: memref<1x8x16xf32, #tpu.memory_space<vmem>>, %arg10: memref<4x10x18xf32, #tpu.memory_space<vmem>>) attributes {dimension_semantics = [#tpu.dimension_semantics<parallel>, #tpu.dimension_semantics<parallel>], iteration_bounds = array<i64: 2, 2>, scalar_prefetch = 0 : i64, scratch_operands = 1 : i64, tpu.core_type = #tpu.core_type<tc>, window_params = [{transform_indices = @transform_0, window_bounds = array<i64: 1, 4, 8, 16>}, {transform_indices = @transform_1, window_bounds = array<i64: 1, 4, 8, 16>}, {transform_indices = @transform_2, window_bounds = array<i64: 1, 4, 8, 16>}, {transform_indices = @transform_3, window_bounds = array<i64: 144>}, {transform_indices = @transform_4, window_bounds = array<i64: 4>}, {transform_indices = @transform_5, window_bounds = array<i64: 4>}, {transform_indices = @transform_6, window_bounds = array<i64: 1>}, {transform_indices = @transform_7, window_bounds = array<i64: 1, 8, 16>}]} {
    %cst = arith.constant 0.000000e+00 : f32
    %0 = vector.broadcast %cst : f32 to vector<4x10x18xf32>
    %c0 = arith.constant 0 : index
    %c0_0 = arith.constant 0 : index
    %c0_1 = arith.constant 0 : index
    %1 = vector.load %arg10[%c0, %c0_0, %c0_1] : memref<4x10x18xf32, #tpu.memory_space<vmem>>, vector<4x10x18xf32>
    tpu.vector_store %arg10[%c0, %c0_0, %c0_1], %0 {strides = array<i32>} : memref<4x10x18xf32, #tpu.memory_space<vmem>>, vector<4x10x18xf32>,
    %c0_2 = arith.constant 0 : index
    %c0_3 = arith.constant 0 : index
    %c0_4 = arith.constant 0 : index
    %c0_5 = arith.constant 0 : index
    %2 = vector.load %arg2[%c0_2, %c0_3, %c0_4, %c0_5] : memref<1x4x8x16xf32, #tpu.memory_space<vmem>>, vector<1x4x8x16xf32>
    %3 = vector.shape_cast %2 : vector<1x4x8x16xf32> to vector<4x8x16xf32>
    %c0_6 = arith.constant 0 : index
    %c1 = arith.constant 1 : index
    %c1_7 = arith.constant 1 : index
    %4 = vector.load %arg10[%c0_6, %c1, %c1_7] : memref<4x10x18xf32, #tpu.memory_space<vmem>>, vector<4x8x16xf32>
    tpu.vector_store %arg10[%c0_6, %c1, %c1_7], %3 {strides = array<i32>} : memref<4x10x18xf32, #tpu.memory_space<vmem>>, vector<4x8x16xf32>,
    %c0_i32 = arith.constant 0 : i32
    %5 = arith.cmpi sgt, %arg1, %c0_i32 : i32
    %6 = arith.extui %5 : i1 to i32
    %7 = arith.sitofp %6 : i32 to f32
    %c1_i32 = arith.constant 1 : i32
    %8 = arith.cmpi slt, %arg1, %c1_i32 : i32
    %9 = arith.extui %8 : i1 to i32
    %10 = arith.sitofp %9 : i32 to f32
    %c0_8 = arith.constant 0 : index
    %c0_9 = arith.constant 0 : index
    %c7 = arith.constant 7 : index
    %c0_10 = arith.constant 0 : index
    %11 = vector.load %arg3[%c0_8, %c0_9, %c7, %c0_10] : memref<1x4x8x16xf32, #tpu.memory_space<vmem>>, vector<1x4x1x16xf32>
    %12 = vector.shape_cast %11 : vector<1x4x1x16xf32> to vector<4x16xf32>
    %13 = vector.broadcast %7 : f32 to vector<4x16xf32>
    %14 = arith.mulf %12, %13 : vector<4x16xf32>
    %c0_11 = arith.constant 0 : index
    %c0_12 = arith.constant 0 : index
    %c1_13 = arith.constant 1 : index
    %15 = vector.load %arg10[%c0_11, %c0_12, %c1_13] : memref<4x10x18xf32, #tpu.memory_space<vmem>>, vector<4x1x16xf32>
    %16 = vector.shape_cast %15 : vector<4x1x16xf32> to vector<4x16xf32>
    %17 = vector.shape_cast %14 : vector<4x16xf32> to vector<4x1x16xf32>
    tpu.vector_store %arg10[%c0_11, %c0_12, %c1_13], %17 {strides = array<i32>} : memref<4x10x18xf32, #tpu.memory_space<vmem>>, vector<4x1x16xf32>,
    %c0_14 = arith.constant 0 : index
    %c0_15 = arith.constant 0 : index
    %c0_16 = arith.constant 0 : index
    %c0_17 = arith.constant 0 : index
    %18 = vector.load %arg4[%c0_14, %c0_15, %c0_16, %c0_17] : memref<1x4x8x16xf32, #tpu.memory_space<vmem>>, vector<1x4x1x16xf32>
    %19 = vector.shape_cast %18 : vector<1x4x1x16xf32> to vector<4x16xf32>
    %20 = vector.broadcast %10 : f32 to vector<4x16xf32>
    %21 = arith.mulf %19, %20 : vector<4x16xf32>
    %c0_18 = arith.constant 0 : index
    %c9 = arith.constant 9 : index
    %c1_19 = arith.constant 1 : index
    %22 = vector.load %arg10[%c0_18, %c9, %c1_19] : memref<4x10x18xf32, #tpu.memory_space<vmem>>, vector<4x1x16xf32>
    %23 = vector.shape_cast %22 : vector<4x1x16xf32> to vector<4x16xf32>
    %24 = vector.shape_cast %21 : vector<4x16xf32> to vector<4x1x16xf32>
    tpu.vector_store %arg10[%c0_18, %c9, %c1_19], %24 {strides = array<i32>} : memref<4x10x18xf32, #tpu.memory_space<vmem>>, vector<4x1x16xf32>,
    %c0_20 = arith.constant 0 : index
    %25 = memref.load %arg6[%c0_20] : memref<4xf32, #tpu.memory_space<smem>>
    %26 = vector.broadcast %25 : f32 to vector<8x16xf32>
    %c1_21 = arith.constant 1 : index
    %27 = memref.load %arg6[%c1_21] : memref<4xf32, #tpu.memory_space<smem>>
    %28 = vector.broadcast %27 : f32 to vector<8x16xf32>
    %c2 = arith.constant 2 : index
    %29 = memref.load %arg6[%c2] : memref<4xf32, #tpu.memory_space<smem>>
    %30 = vector.broadcast %29 : f32 to vector<8x16xf32>
    %c3 = arith.constant 3 : index
    %31 = memref.load %arg6[%c3] : memref<4xf32, #tpu.memory_space<smem>>
    %32 = vector.broadcast %31 : f32 to vector<8x16xf32>
    %c0_22 = arith.constant 0 : index
    %c0_23 = arith.constant 0 : index
    %c0_24 = arith.constant 0 : index
    %33 = vector.load %arg10[%c0_22, %c0_23, %c0_24] : memref<4x10x18xf32, #tpu.memory_space<vmem>>, vector<1x8x16xf32>
    %34 = vector.shape_cast %33 : vector<1x8x16xf32> to vector<8x16xf32>
    %c0_25 = arith.constant 0 : index
    %35 = memref.load %arg5[%c0_25] : memref<144xf32, #tpu.memory_space<smem>>
    %36 = vector.broadcast %35 : f32 to vector<8x16xf32>
    %37 = arith.mulf %36, %34 : vector<8x16xf32>
    %38 = arith.addf %26, %37 : vector<8x16xf32>
    %c36 = arith.constant 36 : index
    %39 = memref.load %arg5[%c36] : memref<144xf32, #tpu.memory_space<smem>>
    %40 = vector.broadcast %39 : f32 to vector<8x16xf32>
    %41 = arith.mulf %40, %34 : vector<8x16xf32>
    %42 = arith.addf %28, %41 : vector<8x16xf32>
    %c72 = arith.constant 72 : index
    %43 = memref.load %arg5[%c72] : memref<144xf32, #tpu.memory_space<smem>>
    %44 = vector.broadcast %43 : f32 to vector<8x16xf32>
    %45 = arith.mulf %44, %34 : vector<8x16xf32>
    %46 = arith.addf %30, %45 : vector<8x16xf32>
    %c108 = arith.constant 108 : index
    %47 = memref.load %arg5[%c108] : memref<144xf32, #tpu.memory_space<smem>>
    %48 = vector.broadcast %47 : f32 to vector<8x16xf32>
    %49 = arith.mulf %48, %34 : vector<8x16xf32>
    %50 = arith.addf %32, %49 : vector<8x16xf32>
    %c0_26 = arith.constant 0 : index
    %c0_27 = arith.constant 0 : index
    %c1_28 = arith.constant 1 : index
    %51 = vector.load %arg10[%c0_26, %c0_27, %c1_28] : memref<4x10x18xf32, #tpu.memory_space<vmem>>, vector<1x8x16xf32>
    %52 = vector.shape_cast %51 : vector<1x8x16xf32> to vector<8x16xf32>
    %c1_29 = arith.constant 1 : index
    %53 = memref.load %arg5[%c1_29] : memref<144xf32, #tpu.memory_space<smem>>
    %54 = vector.broadcast %53 : f32 to vector<8x16xf32>
    %55 = arith.mulf %54, %52 : vector<8x16xf32>
    %56 = arith.addf %38, %55 : vector<8x16xf32>
    %c37 = arith.constant 37 : index
    %57 = memref.load %arg5[%c37] : memref<144xf32, #tpu.memory_space<smem>>
    %58 = vector.broadcast %57 : f32 to vector<8x16xf32>
    %59 = arith.mulf %58, %52 : vector<8x16xf32>
    %60 = arith.addf %42, %59 : vector<8x16xf32>
    %c73 = arith.constant 73 : index
    %61 = memref.load %arg5[%c73] : memref<144xf32, #tpu.memory_space<smem>>
    %62 = vector.broadcast %61 : f32 to vector<8x16xf32>
    %63 = arith.mulf %62, %52 : vector<8x16xf32>
    %64 = arith.addf %46, %63 : vector<8x16xf32>
    %c109 = arith.constant 109 : index
    %65 = memref.load %arg5[%c109] : memref<144xf32, #tpu.memory_space<smem>>
    %66 = vector.broadcast %65 : f32 to vector<8x16xf32>
    %67 = arith.mulf %66, %52 : vector<8x16xf32>
    %68 = arith.addf %50, %67 : vector<8x16xf32>
    %c0_30 = arith.constant 0 : index
    %c0_31 = arith.constant 0 : index
    %c2_32 = arith.constant 2 : index
    %69 = vector.load %arg10[%c0_30, %c0_31, %c2_32] : memref<4x10x18xf32, #tpu.memory_space<vmem>>, vector<1x8x16xf32>
    %70 = vector.shape_cast %69 : vector<1x8x16xf32> to vector<8x16xf32>
    %c2_33 = arith.constant 2 : index
    %71 = memref.load %arg5[%c2_33] : memref<144xf32, #tpu.memory_space<smem>>
    %72 = vector.broadcast %71 : f32 to vector<8x16xf32>
    %73 = arith.mulf %72, %70 : vector<8x16xf32>
    %74 = arith.addf %56, %73 : vector<8x16xf32>
    %c38 = arith.constant 38 : index
    %75 = memref.load %arg5[%c38] : memref<144xf32, #tpu.memory_space<smem>>
    %76 = vector.broadcast %75 : f32 to vector<8x16xf32>
    %77 = arith.mulf %76, %70 : vector<8x16xf32>
    %78 = arith.addf %60, %77 : vector<8x16xf32>
    %c74 = arith.constant 74 : index
    %79 = memref.load %arg5[%c74] : memref<144xf32, #tpu.memory_space<smem>>
    %80 = vector.broadcast %79 : f32 to vector<8x16xf32>
    %81 = arith.mulf %80, %70 : vector<8x16xf32>
    %82 = arith.addf %64, %81 : vector<8x16xf32>
    %c110 = arith.constant 110 : index
    %83 = memref.load %arg5[%c110] : memref<144xf32, #tpu.memory_space<smem>>
    %84 = vector.broadcast %83 : f32 to vector<8x16xf32>
    %85 = arith.mulf %84, %70 : vector<8x16xf32>
    %86 = arith.addf %68, %85 : vector<8x16xf32>
    %c0_34 = arith.constant 0 : index
    %c1_35 = arith.constant 1 : index
    %c0_36 = arith.constant 0 : index
    %87 = vector.load %arg10[%c0_34, %c1_35, %c0_36] : memref<4x10x18xf32, #tpu.memory_space<vmem>>, vector<1x8x16xf32>
    %88 = vector.shape_cast %87 : vector<1x8x16xf32> to vector<8x16xf32>
    %c3_37 = arith.constant 3 : index
    %89 = memref.load %arg5[%c3_37] : memref<144xf32, #tpu.memory_space<smem>>
    %90 = vector.broadcast %89 : f32 to vector<8x16xf32>
    %91 = arith.mulf %90, %88 : vector<8x16xf32>
    %92 = arith.addf %74, %91 : vector<8x16xf32>
    %c39 = arith.constant 39 : index
    %93 = memref.load %arg5[%c39] : memref<144xf32, #tpu.memory_space<smem>>
    %94 = vector.broadcast %93 : f32 to vector<8x16xf32>
    %95 = arith.mulf %94, %88 : vector<8x16xf32>
    %96 = arith.addf %78, %95 : vector<8x16xf32>
    %c75 = arith.constant 75 : index
    %97 = memref.load %arg5[%c75] : memref<144xf32, #tpu.memory_space<smem>>
    %98 = vector.broadcast %97 : f32 to vector<8x16xf32>
    %99 = arith.mulf %98, %88 : vector<8x16xf32>
    %100 = arith.addf %82, %99 : vector<8x16xf32>
    %c111 = arith.constant 111 : index
    %101 = memref.load %arg5[%c111] : memref<144xf32, #tpu.memory_space<smem>>
    %102 = vector.broadcast %101 : f32 to vector<8x16xf32>
    %103 = arith.mulf %102, %88 : vector<8x16xf32>
    %104 = arith.addf %86, %103 : vector<8x16xf32>
    %c0_38 = arith.constant 0 : index
    %c1_39 = arith.constant 1 : index
    %c1_40 = arith.constant 1 : index
    %105 = vector.load %arg10[%c0_38, %c1_39, %c1_40] : memref<4x10x18xf32, #tpu.memory_space<vmem>>, vector<1x8x16xf32>
    %106 = vector.shape_cast %105 : vector<1x8x16xf32> to vector<8x16xf32>
    %c4 = arith.constant 4 : index
    %107 = memref.load %arg5[%c4] : memref<144xf32, #tpu.memory_space<smem>>
    %108 = vector.broadcast %107 : f32 to vector<8x16xf32>
    %109 = arith.mulf %108, %106 : vector<8x16xf32>
    %110 = arith.addf %92, %109 : vector<8x16xf32>
    %c40 = arith.constant 40 : index
    %111 = memref.load %arg5[%c40] : memref<144xf32, #tpu.memory_space<smem>>
    %112 = vector.broadcast %111 : f32 to vector<8x16xf32>
    %113 = arith.mulf %112, %106 : vector<8x16xf32>
    %114 = arith.addf %96, %113 : vector<8x16xf32>
    %c76 = arith.constant 76 : index
    %115 = memref.load %arg5[%c76] : memref<144xf32, #tpu.memory_space<smem>>
    %116 = vector.broadcast %115 : f32 to vector<8x16xf32>
    %117 = arith.mulf %116, %106 : vector<8x16xf32>
    %118 = arith.addf %100, %117 : vector<8x16xf32>
    %c112 = arith.constant 112 : index
    %119 = memref.load %arg5[%c112] : memref<144xf32, #tpu.memory_space<smem>>
    %120 = vector.broadcast %119 : f32 to vector<8x16xf32>
    %121 = arith.mulf %120, %106 : vector<8x16xf32>
    %122 = arith.addf %104, %121 : vector<8x16xf32>
    %c0_41 = arith.constant 0 : index
    %c1_42 = arith.constant 1 : index
    %c2_43 = arith.constant 2 : index
    %123 = vector.load %arg10[%c0_41, %c1_42, %c2_43] : memref<4x10x18xf32, #tpu.memory_space<vmem>>, vector<1x8x16xf32>
    %124 = vector.shape_cast %123 : vector<1x8x16xf32> to vector<8x16xf32>
    %c5 = arith.constant 5 : index
    %125 = memref.load %arg5[%c5] : memref<144xf32, #tpu.memory_space<smem>>
    %126 = vector.broadcast %125 : f32 to vector<8x16xf32>
    %127 = arith.mulf %126, %124 : vector<8x16xf32>
    %128 = arith.addf %110, %127 : vector<8x16xf32>
    %c41 = arith.constant 41 : index
    %129 = memref.load %arg5[%c41] : memref<144xf32, #tpu.memory_space<smem>>
    %130 = vector.broadcast %129 : f32 to vector<8x16xf32>
    %131 = arith.mulf %130, %124 : vector<8x16xf32>
    %132 = arith.addf %114, %131 : vector<8x16xf32>
    %c77 = arith.constant 77 : index
    %133 = memref.load %arg5[%c77] : memref<144xf32, #tpu.memory_space<smem>>
    %134 = vector.broadcast %133 : f32 to vector<8x16xf32>
    %135 = arith.mulf %134, %124 : vector<8x16xf32>
    %136 = arith.addf %118, %135 : vector<8x16xf32>
    %c113 = arith.constant 113 : index
    %137 = memref.load %arg5[%c113] : memref<144xf32, #tpu.memory_space<smem>>
    %138 = vector.broadcast %137 : f32 to vector<8x16xf32>
    %139 = arith.mulf %138, %124 : vector<8x16xf32>
    %140 = arith.addf %122, %139 : vector<8x16xf32>
    %c0_44 = arith.constant 0 : index
    %c2_45 = arith.constant 2 : index
    %c0_46 = arith.constant 0 : index
    %141 = vector.load %arg10[%c0_44, %c2_45, %c0_46] : memref<4x10x18xf32, #tpu.memory_space<vmem>>, vector<1x8x16xf32>
    %142 = vector.shape_cast %141 : vector<1x8x16xf32> to vector<8x16xf32>
    %c6 = arith.constant 6 : index
    %143 = memref.load %arg5[%c6] : memref<144xf32, #tpu.memory_space<smem>>
    %144 = vector.broadcast %143 : f32 to vector<8x16xf32>
    %145 = arith.mulf %144, %142 : vector<8x16xf32>
    %146 = arith.addf %128, %145 : vector<8x16xf32>
    %c42 = arith.constant 42 : index
    %147 = memref.load %arg5[%c42] : memref<144xf32, #tpu.memory_space<smem>>
    %148 = vector.broadcast %147 : f32 to vector<8x16xf32>
    %149 = arith.mulf %148, %142 : vector<8x16xf32>
    %150 = arith.addf %132, %149 : vector<8x16xf32>
    %c78 = arith.constant 78 : index
    %151 = memref.load %arg5[%c78] : memref<144xf32, #tpu.memory_space<smem>>
    %152 = vector.broadcast %151 : f32 to vector<8x16xf32>
    %153 = arith.mulf %152, %142 : vector<8x16xf32>
    %154 = arith.addf %136, %153 : vector<8x16xf32>
    %c114 = arith.constant 114 : index
    %155 = memref.load %arg5[%c114] : memref<144xf32, #tpu.memory_space<smem>>
    %156 = vector.broadcast %155 : f32 to vector<8x16xf32>
    %157 = arith.mulf %156, %142 : vector<8x16xf32>
    %158 = arith.addf %140, %157 : vector<8x16xf32>
    %c0_47 = arith.constant 0 : index
    %c2_48 = arith.constant 2 : index
    %c1_49 = arith.constant 1 : index
    %159 = vector.load %arg10[%c0_47, %c2_48, %c1_49] : memref<4x10x18xf32, #tpu.memory_space<vmem>>, vector<1x8x16xf32>
    %160 = vector.shape_cast %159 : vector<1x8x16xf32> to vector<8x16xf32>
    %c7_50 = arith.constant 7 : index
    %161 = memref.load %arg5[%c7_50] : memref<144xf32, #tpu.memory_space<smem>>
    %162 = vector.broadcast %161 : f32 to vector<8x16xf32>
    %163 = arith.mulf %162, %160 : vector<8x16xf32>
    %164 = arith.addf %146, %163 : vector<8x16xf32>
    %c43 = arith.constant 43 : index
    %165 = memref.load %arg5[%c43] : memref<144xf32, #tpu.memory_space<smem>>
    %166 = vector.broadcast %165 : f32 to vector<8x16xf32>
    %167 = arith.mulf %166, %160 : vector<8x16xf32>
    %168 = arith.addf %150, %167 : vector<8x16xf32>
    %c79 = arith.constant 79 : index
    %169 = memref.load %arg5[%c79] : memref<144xf32, #tpu.memory_space<smem>>
    %170 = vector.broadcast %169 : f32 to vector<8x16xf32>
    %171 = arith.mulf %170, %160 : vector<8x16xf32>
    %172 = arith.addf %154, %171 : vector<8x16xf32>
    %c115 = arith.constant 115 : index
    %173 = memref.load %arg5[%c115] : memref<144xf32, #tpu.memory_space<smem>>
    %174 = vector.broadcast %173 : f32 to vector<8x16xf32>
    %175 = arith.mulf %174, %160 : vector<8x16xf32>
    %176 = arith.addf %158, %175 : vector<8x16xf32>
    %c0_51 = arith.constant 0 : index
    %c2_52 = arith.constant 2 : index
    %c2_53 = arith.constant 2 : index
    %177 = vector.load %arg10[%c0_51, %c2_52, %c2_53] : memref<4x10x18xf32, #tpu.memory_space<vmem>>, vector<1x8x16xf32>
    %178 = vector.shape_cast %177 : vector<1x8x16xf32> to vector<8x16xf32>
    %c8 = arith.constant 8 : index
    %179 = memref.load %arg5[%c8] : memref<144xf32, #tpu.memory_space<smem>>
    %180 = vector.broadcast %179 : f32 to vector<8x16xf32>
    %181 = arith.mulf %180, %178 : vector<8x16xf32>
    %182 = arith.addf %164, %181 : vector<8x16xf32>
    %c44 = arith.constant 44 : index
    %183 = memref.load %arg5[%c44] : memref<144xf32, #tpu.memory_space<smem>>
    %184 = vector.broadcast %183 : f32 to vector<8x16xf32>
    %185 = arith.mulf %184, %178 : vector<8x16xf32>
    %186 = arith.addf %168, %185 : vector<8x16xf32>
    %c80 = arith.constant 80 : index
    %187 = memref.load %arg5[%c80] : memref<144xf32, #tpu.memory_space<smem>>
    %188 = vector.broadcast %187 : f32 to vector<8x16xf32>
    %189 = arith.mulf %188, %178 : vector<8x16xf32>
    %190 = arith.addf %172, %189 : vector<8x16xf32>
    %c116 = arith.constant 116 : index
    %191 = memref.load %arg5[%c116] : memref<144xf32, #tpu.memory_space<smem>>
    %192 = vector.broadcast %191 : f32 to vector<8x16xf32>
    %193 = arith.mulf %192, %178 : vector<8x16xf32>
    %194 = arith.addf %176, %193 : vector<8x16xf32>
    %c1_54 = arith.constant 1 : index
    %c0_55 = arith.constant 0 : index
    %c0_56 = arith.constant 0 : index
    %195 = vector.load %arg10[%c1_54, %c0_55, %c0_56] : memref<4x10x18xf32, #tpu.memory_space<vmem>>, vector<1x8x16xf32>
    %196 = vector.shape_cast %195 : vector<1x8x16xf32> to vector<8x16xf32>
    %c9_57 = arith.constant 9 : index
    %197 = memref.load %arg5[%c9_57] : memref<144xf32, #tpu.memory_space<smem>>
    %198 = vector.broadcast %197 : f32 to vector<8x16xf32>
    %199 = arith.mulf %198, %196 : vector<8x16xf32>
    %200 = arith.addf %182, %199 : vector<8x16xf32>
    %c45 = arith.constant 45 : index
    %201 = memref.load %arg5[%c45] : memref<144xf32, #tpu.memory_space<smem>>
    %202 = vector.broadcast %201 : f32 to vector<8x16xf32>
    %203 = arith.mulf %202, %196 : vector<8x16xf32>
    %204 = arith.addf %186, %203 : vector<8x16xf32>
    %c81 = arith.constant 81 : index
    %205 = memref.load %arg5[%c81] : memref<144xf32, #tpu.memory_space<smem>>
    %206 = vector.broadcast %205 : f32 to vector<8x16xf32>
    %207 = arith.mulf %206, %196 : vector<8x16xf32>
    %208 = arith.addf %190, %207 : vector<8x16xf32>
    %c117 = arith.constant 117 : index
    %209 = memref.load %arg5[%c117] : memref<144xf32, #tpu.memory_space<smem>>
    %210 = vector.broadcast %209 : f32 to vector<8x16xf32>
    %211 = arith.mulf %210, %196 : vector<8x16xf32>
    %212 = arith.addf %194, %211 : vector<8x16xf32>
    %c1_58 = arith.constant 1 : index
    %c0_59 = arith.constant 0 : index
    %c1_60 = arith.constant 1 : index
    %213 = vector.load %arg10[%c1_58, %c0_59, %c1_60] : memref<4x10x18xf32, #tpu.memory_space<vmem>>, vector<1x8x16xf32>
    %214 = vector.shape_cast %213 : vector<1x8x16xf32> to vector<8x16xf32>
    %c10 = arith.constant 10 : index
    %215 = memref.load %arg5[%c10] : memref<144xf32, #tpu.memory_space<smem>>
    %216 = vector.broadcast %215 : f32 to vector<8x16xf32>
    %217 = arith.mulf %216, %214 : vector<8x16xf32>
    %218 = arith.addf %200, %217 : vector<8x16xf32>
    %c46 = arith.constant 46 : index
    %219 = memref.load %arg5[%c46] : memref<144xf32, #tpu.memory_space<smem>>
    %220 = vector.broadcast %219 : f32 to vector<8x16xf32>
    %221 = arith.mulf %220, %214 : vector<8x16xf32>
    %222 = arith.addf %204, %221 : vector<8x16xf32>
    %c82 = arith.constant 82 : index
    %223 = memref.load %arg5[%c82] : memref<144xf32, #tpu.memory_space<smem>>
    %224 = vector.broadcast %223 : f32 to vector<8x16xf32>
    %225 = arith.mulf %224, %214 : vector<8x16xf32>
    %226 = arith.addf %208, %225 : vector<8x16xf32>
    %c118 = arith.constant 118 : index
    %227 = memref.load %arg5[%c118] : memref<144xf32, #tpu.memory_space<smem>>
    %228 = vector.broadcast %227 : f32 to vector<8x16xf32>
    %229 = arith.mulf %228, %214 : vector<8x16xf32>
    %230 = arith.addf %212, %229 : vector<8x16xf32>
    %c1_61 = arith.constant 1 : index
    %c0_62 = arith.constant 0 : index
    %c2_63 = arith.constant 2 : index
    %231 = vector.load %arg10[%c1_61, %c0_62, %c2_63] : memref<4x10x18xf32, #tpu.memory_space<vmem>>, vector<1x8x16xf32>
    %232 = vector.shape_cast %231 : vector<1x8x16xf32> to vector<8x16xf32>
    %c11 = arith.constant 11 : index
    %233 = memref.load %arg5[%c11] : memref<144xf32, #tpu.memory_space<smem>>
    %234 = vector.broadcast %233 : f32 to vector<8x16xf32>
    %235 = arith.mulf %234, %232 : vector<8x16xf32>
    %236 = arith.addf %218, %235 : vector<8x16xf32>
    %c47 = arith.constant 47 : index
    %237 = memref.load %arg5[%c47] : memref<144xf32, #tpu.memory_space<smem>>
    %238 = vector.broadcast %237 : f32 to vector<8x16xf32>
    %239 = arith.mulf %238, %232 : vector<8x16xf32>
    %240 = arith.addf %222, %239 : vector<8x16xf32>
    %c83 = arith.constant 83 : index
    %241 = memref.load %arg5[%c83] : memref<144xf32, #tpu.memory_space<smem>>
    %242 = vector.broadcast %241 : f32 to vector<8x16xf32>
    %243 = arith.mulf %242, %232 : vector<8x16xf32>
    %244 = arith.addf %226, %243 : vector<8x16xf32>
    %c119 = arith.constant 119 : index
    %245 = memref.load %arg5[%c119] : memref<144xf32, #tpu.memory_space<smem>>
    %246 = vector.broadcast %245 : f32 to vector<8x16xf32>
    %247 = arith.mulf %246, %232 : vector<8x16xf32>
    %248 = arith.addf %230, %247 : vector<8x16xf32>
    %c1_64 = arith.constant 1 : index
    %c1_65 = arith.constant 1 : index
    %c0_66 = arith.constant 0 : index
    %249 = vector.load %arg10[%c1_64, %c1_65, %c0_66] : memref<4x10x18xf32, #tpu.memory_space<vmem>>, vector<1x8x16xf32>
    %250 = vector.shape_cast %249 : vector<1x8x16xf32> to vector<8x16xf32>
    %c12 = arith.constant 12 : index
    %251 = memref.load %arg5[%c12] : memref<144xf32, #tpu.memory_space<smem>>
    %252 = vector.broadcast %251 : f32 to vector<8x16xf32>
    %253 = arith.mulf %252, %250 : vector<8x16xf32>
    %254 = arith.addf %236, %253 : vector<8x16xf32>
    %c48 = arith.constant 48 : index
    %255 = memref.load %arg5[%c48] : memref<144xf32, #tpu.memory_space<smem>>
    %256 = vector.broadcast %255 : f32 to vector<8x16xf32>
    %257 = arith.mulf %256, %250 : vector<8x16xf32>
    %258 = arith.addf %240, %257 : vector<8x16xf32>
    %c84 = arith.constant 84 : index
    %259 = memref.load %arg5[%c84] : memref<144xf32, #tpu.memory_space<smem>>
    %260 = vector.broadcast %259 : f32 to vector<8x16xf32>
    %261 = arith.mulf %260, %250 : vector<8x16xf32>
    %262 = arith.addf %244, %261 : vector<8x16xf32>
    %c120 = arith.constant 120 : index
    %263 = memref.load %arg5[%c120] : memref<144xf32, #tpu.memory_space<smem>>
    %264 = vector.broadcast %263 : f32 to vector<8x16xf32>
    %265 = arith.mulf %264, %250 : vector<8x16xf32>
    %266 = arith.addf %248, %265 : vector<8x16xf32>
    %c1_67 = arith.constant 1 : index
    %c1_68 = arith.constant 1 : index
    %c1_69 = arith.constant 1 : index
    %267 = vector.load %arg10[%c1_67, %c1_68, %c1_69] : memref<4x10x18xf32, #tpu.memory_space<vmem>>, vector<1x8x16xf32>
    %268 = vector.shape_cast %267 : vector<1x8x16xf32> to vector<8x16xf32>
    %c13 = arith.constant 13 : index
    %269 = memref.load %arg5[%c13] : memref<144xf32, #tpu.memory_space<smem>>
    %270 = vector.broadcast %269 : f32 to vector<8x16xf32>
    %271 = arith.mulf %270, %268 : vector<8x16xf32>
    %272 = arith.addf %254, %271 : vector<8x16xf32>
    %c49 = arith.constant 49 : index
    %273 = memref.load %arg5[%c49] : memref<144xf32, #tpu.memory_space<smem>>
    %274 = vector.broadcast %273 : f32 to vector<8x16xf32>
    %275 = arith.mulf %274, %268 : vector<8x16xf32>
    %276 = arith.addf %258, %275 : vector<8x16xf32>
    %c85 = arith.constant 85 : index
    %277 = memref.load %arg5[%c85] : memref<144xf32, #tpu.memory_space<smem>>
    %278 = vector.broadcast %277 : f32 to vector<8x16xf32>
    %279 = arith.mulf %278, %268 : vector<8x16xf32>
    %280 = arith.addf %262, %279 : vector<8x16xf32>
    %c121 = arith.constant 121 : index
    %281 = memref.load %arg5[%c121] : memref<144xf32, #tpu.memory_space<smem>>
    %282 = vector.broadcast %281 : f32 to vector<8x16xf32>
    %283 = arith.mulf %282, %268 : vector<8x16xf32>
    %284 = arith.addf %266, %283 : vector<8x16xf32>
    %c1_70 = arith.constant 1 : index
    %c1_71 = arith.constant 1 : index
    %c2_72 = arith.constant 2 : index
    %285 = vector.load %arg10[%c1_70, %c1_71, %c2_72] : memref<4x10x18xf32, #tpu.memory_space<vmem>>, vector<1x8x16xf32>
    %286 = vector.shape_cast %285 : vector<1x8x16xf32> to vector<8x16xf32>
    %c14 = arith.constant 14 : index
    %287 = memref.load %arg5[%c14] : memref<144xf32, #tpu.memory_space<smem>>
    %288 = vector.broadcast %287 : f32 to vector<8x16xf32>
    %289 = arith.mulf %288, %286 : vector<8x16xf32>
    %290 = arith.addf %272, %289 : vector<8x16xf32>
    %c50 = arith.constant 50 : index
    %291 = memref.load %arg5[%c50] : memref<144xf32, #tpu.memory_space<smem>>
    %292 = vector.broadcast %291 : f32 to vector<8x16xf32>
    %293 = arith.mulf %292, %286 : vector<8x16xf32>
    %294 = arith.addf %276, %293 : vector<8x16xf32>
    %c86 = arith.constant 86 : index
    %295 = memref.load %arg5[%c86] : memref<144xf32, #tpu.memory_space<smem>>
    %296 = vector.broadcast %295 : f32 to vector<8x16xf32>
    %297 = arith.mulf %296, %286 : vector<8x16xf32>
    %298 = arith.addf %280, %297 : vector<8x16xf32>
    %c122 = arith.constant 122 : index
    %299 = memref.load %arg5[%c122] : memref<144xf32, #tpu.memory_space<smem>>
    %300 = vector.broadcast %299 : f32 to vector<8x16xf32>
    %301 = arith.mulf %300, %286 : vector<8x16xf32>
    %302 = arith.addf %284, %301 : vector<8x16xf32>
    %c1_73 = arith.constant 1 : index
    %c2_74 = arith.constant 2 : index
    %c0_75 = arith.constant 0 : index
    %303 = vector.load %arg10[%c1_73, %c2_74, %c0_75] : memref<4x10x18xf32, #tpu.memory_space<vmem>>, vector<1x8x16xf32>
    %304 = vector.shape_cast %303 : vector<1x8x16xf32> to vector<8x16xf32>
    %c15 = arith.constant 15 : index
    %305 = memref.load %arg5[%c15] : memref<144xf32, #tpu.memory_space<smem>>
    %306 = vector.broadcast %305 : f32 to vector<8x16xf32>
    %307 = arith.mulf %306, %304 : vector<8x16xf32>
    %308 = arith.addf %290, %307 : vector<8x16xf32>
    %c51 = arith.constant 51 : index
    %309 = memref.load %arg5[%c51] : memref<144xf32, #tpu.memory_space<smem>>
    %310 = vector.broadcast %309 : f32 to vector<8x16xf32>
    %311 = arith.mulf %310, %304 : vector<8x16xf32>
    %312 = arith.addf %294, %311 : vector<8x16xf32>
    %c87 = arith.constant 87 : index
    %313 = memref.load %arg5[%c87] : memref<144xf32, #tpu.memory_space<smem>>
    %314 = vector.broadcast %313 : f32 to vector<8x16xf32>
    %315 = arith.mulf %314, %304 : vector<8x16xf32>
    %316 = arith.addf %298, %315 : vector<8x16xf32>
    %c123 = arith.constant 123 : index
    %317 = memref.load %arg5[%c123] : memref<144xf32, #tpu.memory_space<smem>>
    %318 = vector.broadcast %317 : f32 to vector<8x16xf32>
    %319 = arith.mulf %318, %304 : vector<8x16xf32>
    %320 = arith.addf %302, %319 : vector<8x16xf32>
    %c1_76 = arith.constant 1 : index
    %c2_77 = arith.constant 2 : index
    %c1_78 = arith.constant 1 : index
    %321 = vector.load %arg10[%c1_76, %c2_77, %c1_78] : memref<4x10x18xf32, #tpu.memory_space<vmem>>, vector<1x8x16xf32>
    %322 = vector.shape_cast %321 : vector<1x8x16xf32> to vector<8x16xf32>
    %c16 = arith.constant 16 : index
    %323 = memref.load %arg5[%c16] : memref<144xf32, #tpu.memory_space<smem>>
    %324 = vector.broadcast %323 : f32 to vector<8x16xf32>
    %325 = arith.mulf %324, %322 : vector<8x16xf32>
    %326 = arith.addf %308, %325 : vector<8x16xf32>
    %c52 = arith.constant 52 : index
    %327 = memref.load %arg5[%c52] : memref<144xf32, #tpu.memory_space<smem>>
    %328 = vector.broadcast %327 : f32 to vector<8x16xf32>
    %329 = arith.mulf %328, %322 : vector<8x16xf32>
    %330 = arith.addf %312, %329 : vector<8x16xf32>
    %c88 = arith.constant 88 : index
    %331 = memref.load %arg5[%c88] : memref<144xf32, #tpu.memory_space<smem>>
    %332 = vector.broadcast %331 : f32 to vector<8x16xf32>
    %333 = arith.mulf %332, %322 : vector<8x16xf32>
    %334 = arith.addf %316, %333 : vector<8x16xf32>
    %c124 = arith.constant 124 : index
    %335 = memref.load %arg5[%c124] : memref<144xf32, #tpu.memory_space<smem>>
    %336 = vector.broadcast %335 : f32 to vector<8x16xf32>
    %337 = arith.mulf %336, %322 : vector<8x16xf32>
    %338 = arith.addf %320, %337 : vector<8x16xf32>
    %c1_79 = arith.constant 1 : index
    %c2_80 = arith.constant 2 : index
    %c2_81 = arith.constant 2 : index
    %339 = vector.load %arg10[%c1_79, %c2_80, %c2_81] : memref<4x10x18xf32, #tpu.memory_space<vmem>>, vector<1x8x16xf32>
    %340 = vector.shape_cast %339 : vector<1x8x16xf32> to vector<8x16xf32>
    %c17 = arith.constant 17 : index
    %341 = memref.load %arg5[%c17] : memref<144xf32, #tpu.memory_space<smem>>
    %342 = vector.broadcast %341 : f32 to vector<8x16xf32>
    %343 = arith.mulf %342, %340 : vector<8x16xf32>
    %344 = arith.addf %326, %343 : vector<8x16xf32>
    %c53 = arith.constant 53 : index
    %345 = memref.load %arg5[%c53] : memref<144xf32, #tpu.memory_space<smem>>
    %346 = vector.broadcast %345 : f32 to vector<8x16xf32>
    %347 = arith.mulf %346, %340 : vector<8x16xf32>
    %348 = arith.addf %330, %347 : vector<8x16xf32>
    %c89 = arith.constant 89 : index
    %349 = memref.load %arg5[%c89] : memref<144xf32, #tpu.memory_space<smem>>
    %350 = vector.broadcast %349 : f32 to vector<8x16xf32>
    %351 = arith.mulf %350, %340 : vector<8x16xf32>
    %352 = arith.addf %334, %351 : vector<8x16xf32>
    %c125 = arith.constant 125 : index
    %353 = memref.load %arg5[%c125] : memref<144xf32, #tpu.memory_space<smem>>
    %354 = vector.broadcast %353 : f32 to vector<8x16xf32>
    %355 = arith.mulf %354, %340 : vector<8x16xf32>
    %356 = arith.addf %338, %355 : vector<8x16xf32>
    %c2_82 = arith.constant 2 : index
    %c0_83 = arith.constant 0 : index
    %c0_84 = arith.constant 0 : index
    %357 = vector.load %arg10[%c2_82, %c0_83, %c0_84] : memref<4x10x18xf32, #tpu.memory_space<vmem>>, vector<1x8x16xf32>
    %358 = vector.shape_cast %357 : vector<1x8x16xf32> to vector<8x16xf32>
    %c18 = arith.constant 18 : index
    %359 = memref.load %arg5[%c18] : memref<144xf32, #tpu.memory_space<smem>>
    %360 = vector.broadcast %359 : f32 to vector<8x16xf32>
    %361 = arith.mulf %360, %358 : vector<8x16xf32>
    %362 = arith.addf %344, %361 : vector<8x16xf32>
    %c54 = arith.constant 54 : index
    %363 = memref.load %arg5[%c54] : memref<144xf32, #tpu.memory_space<smem>>
    %364 = vector.broadcast %363 : f32 to vector<8x16xf32>
    %365 = arith.mulf %364, %358 : vector<8x16xf32>
    %366 = arith.addf %348, %365 : vector<8x16xf32>
    %c90 = arith.constant 90 : index
    %367 = memref.load %arg5[%c90] : memref<144xf32, #tpu.memory_space<smem>>
    %368 = vector.broadcast %367 : f32 to vector<8x16xf32>
    %369 = arith.mulf %368, %358 : vector<8x16xf32>
    %370 = arith.addf %352, %369 : vector<8x16xf32>
    %c126 = arith.constant 126 : index
    %371 = memref.load %arg5[%c126] : memref<144xf32, #tpu.memory_space<smem>>
    %372 = vector.broadcast %371 : f32 to vector<8x16xf32>
    %373 = arith.mulf %372, %358 : vector<8x16xf32>
    %374 = arith.addf %356, %373 : vector<8x16xf32>
    %c2_85 = arith.constant 2 : index
    %c0_86 = arith.constant 0 : index
    %c1_87 = arith.constant 1 : index
    %375 = vector.load %arg10[%c2_85, %c0_86, %c1_87] : memref<4x10x18xf32, #tpu.memory_space<vmem>>, vector<1x8x16xf32>
    %376 = vector.shape_cast %375 : vector<1x8x16xf32> to vector<8x16xf32>
    %c19 = arith.constant 19 : index
    %377 = memref.load %arg5[%c19] : memref<144xf32, #tpu.memory_space<smem>>
    %378 = vector.broadcast %377 : f32 to vector<8x16xf32>
    %379 = arith.mulf %378, %376 : vector<8x16xf32>
    %380 = arith.addf %362, %379 : vector<8x16xf32>
    %c55 = arith.constant 55 : index
    %381 = memref.load %arg5[%c55] : memref<144xf32, #tpu.memory_space<smem>>
    %382 = vector.broadcast %381 : f32 to vector<8x16xf32>
    %383 = arith.mulf %382, %376 : vector<8x16xf32>
    %384 = arith.addf %366, %383 : vector<8x16xf32>
    %c91 = arith.constant 91 : index
    %385 = memref.load %arg5[%c91] : memref<144xf32, #tpu.memory_space<smem>>
    %386 = vector.broadcast %385 : f32 to vector<8x16xf32>
    %387 = arith.mulf %386, %376 : vector<8x16xf32>
    %388 = arith.addf %370, %387 : vector<8x16xf32>
    %c127 = arith.constant 127 : index
    %389 = memref.load %arg5[%c127] : memref<144xf32, #tpu.memory_space<smem>>
    %390 = vector.broadcast %389 : f32 to vector<8x16xf32>
    %391 = arith.mulf %390, %376 : vector<8x16xf32>
    %392 = arith.addf %374, %391 : vector<8x16xf32>
    %c2_88 = arith.constant 2 : index
    %c0_89 = arith.constant 0 : index
    %c2_90 = arith.constant 2 : index
    %393 = vector.load %arg10[%c2_88, %c0_89, %c2_90] : memref<4x10x18xf32, #tpu.memory_space<vmem>>, vector<1x8x16xf32>
    %394 = vector.shape_cast %393 : vector<1x8x16xf32> to vector<8x16xf32>
    %c20 = arith.constant 20 : index
    %395 = memref.load %arg5[%c20] : memref<144xf32, #tpu.memory_space<smem>>
    %396 = vector.broadcast %395 : f32 to vector<8x16xf32>
    %397 = arith.mulf %396, %394 : vector<8x16xf32>
    %398 = arith.addf %380, %397 : vector<8x16xf32>
    %c56 = arith.constant 56 : index
    %399 = memref.load %arg5[%c56] : memref<144xf32, #tpu.memory_space<smem>>
    %400 = vector.broadcast %399 : f32 to vector<8x16xf32>
    %401 = arith.mulf %400, %394 : vector<8x16xf32>
    %402 = arith.addf %384, %401 : vector<8x16xf32>
    %c92 = arith.constant 92 : index
    %403 = memref.load %arg5[%c92] : memref<144xf32, #tpu.memory_space<smem>>
    %404 = vector.broadcast %403 : f32 to vector<8x16xf32>
    %405 = arith.mulf %404, %394 : vector<8x16xf32>
    %406 = arith.addf %388, %405 : vector<8x16xf32>
    %c128 = arith.constant 128 : index
    %407 = memref.load %arg5[%c128] : memref<144xf32, #tpu.memory_space<smem>>
    %408 = vector.broadcast %407 : f32 to vector<8x16xf32>
    %409 = arith.mulf %408, %394 : vector<8x16xf32>
    %410 = arith.addf %392, %409 : vector<8x16xf32>
    %c2_91 = arith.constant 2 : index
    %c1_92 = arith.constant 1 : index
    %c0_93 = arith.constant 0 : index
    %411 = vector.load %arg10[%c2_91, %c1_92, %c0_93] : memref<4x10x18xf32, #tpu.memory_space<vmem>>, vector<1x8x16xf32>
    %412 = vector.shape_cast %411 : vector<1x8x16xf32> to vector<8x16xf32>
    %c21 = arith.constant 21 : index
    %413 = memref.load %arg5[%c21] : memref<144xf32, #tpu.memory_space<smem>>
    %414 = vector.broadcast %413 : f32 to vector<8x16xf32>
    %415 = arith.mulf %414, %412 : vector<8x16xf32>
    %416 = arith.addf %398, %415 : vector<8x16xf32>
    %c57 = arith.constant 57 : index
    %417 = memref.load %arg5[%c57] : memref<144xf32, #tpu.memory_space<smem>>
    %418 = vector.broadcast %417 : f32 to vector<8x16xf32>
    %419 = arith.mulf %418, %412 : vector<8x16xf32>
    %420 = arith.addf %402, %419 : vector<8x16xf32>
    %c93 = arith.constant 93 : index
    %421 = memref.load %arg5[%c93] : memref<144xf32, #tpu.memory_space<smem>>
    %422 = vector.broadcast %421 : f32 to vector<8x16xf32>
    %423 = arith.mulf %422, %412 : vector<8x16xf32>
    %424 = arith.addf %406, %423 : vector<8x16xf32>
    %c129 = arith.constant 129 : index
    %425 = memref.load %arg5[%c129] : memref<144xf32, #tpu.memory_space<smem>>
    %426 = vector.broadcast %425 : f32 to vector<8x16xf32>
    %427 = arith.mulf %426, %412 : vector<8x16xf32>
    %428 = arith.addf %410, %427 : vector<8x16xf32>
    %c2_94 = arith.constant 2 : index
    %c1_95 = arith.constant 1 : index
    %c1_96 = arith.constant 1 : index
    %429 = vector.load %arg10[%c2_94, %c1_95, %c1_96] : memref<4x10x18xf32, #tpu.memory_space<vmem>>, vector<1x8x16xf32>
    %430 = vector.shape_cast %429 : vector<1x8x16xf32> to vector<8x16xf32>
    %c22 = arith.constant 22 : index
    %431 = memref.load %arg5[%c22] : memref<144xf32, #tpu.memory_space<smem>>
    %432 = vector.broadcast %431 : f32 to vector<8x16xf32>
    %433 = arith.mulf %432, %430 : vector<8x16xf32>
    %434 = arith.addf %416, %433 : vector<8x16xf32>
    %c58 = arith.constant 58 : index
    %435 = memref.load %arg5[%c58] : memref<144xf32, #tpu.memory_space<smem>>
    %436 = vector.broadcast %435 : f32 to vector<8x16xf32>
    %437 = arith.mulf %436, %430 : vector<8x16xf32>
    %438 = arith.addf %420, %437 : vector<8x16xf32>
    %c94 = arith.constant 94 : index
    %439 = memref.load %arg5[%c94] : memref<144xf32, #tpu.memory_space<smem>>
    %440 = vector.broadcast %439 : f32 to vector<8x16xf32>
    %441 = arith.mulf %440, %430 : vector<8x16xf32>
    %442 = arith.addf %424, %441 : vector<8x16xf32>
    %c130 = arith.constant 130 : index
    %443 = memref.load %arg5[%c130] : memref<144xf32, #tpu.memory_space<smem>>
    %444 = vector.broadcast %443 : f32 to vector<8x16xf32>
    %445 = arith.mulf %444, %430 : vector<8x16xf32>
    %446 = arith.addf %428, %445 : vector<8x16xf32>
    %c2_97 = arith.constant 2 : index
    %c1_98 = arith.constant 1 : index
    %c2_99 = arith.constant 2 : index
    %447 = vector.load %arg10[%c2_97, %c1_98, %c2_99] : memref<4x10x18xf32, #tpu.memory_space<vmem>>, vector<1x8x16xf32>
    %448 = vector.shape_cast %447 : vector<1x8x16xf32> to vector<8x16xf32>
    %c23 = arith.constant 23 : index
    %449 = memref.load %arg5[%c23] : memref<144xf32, #tpu.memory_space<smem>>
    %450 = vector.broadcast %449 : f32 to vector<8x16xf32>
    %451 = arith.mulf %450, %448 : vector<8x16xf32>
    %452 = arith.addf %434, %451 : vector<8x16xf32>
    %c59 = arith.constant 59 : index
    %453 = memref.load %arg5[%c59] : memref<144xf32, #tpu.memory_space<smem>>
    %454 = vector.broadcast %453 : f32 to vector<8x16xf32>
    %455 = arith.mulf %454, %448 : vector<8x16xf32>
    %456 = arith.addf %438, %455 : vector<8x16xf32>
    %c95 = arith.constant 95 : index
    %457 = memref.load %arg5[%c95] : memref<144xf32, #tpu.memory_space<smem>>
    %458 = vector.broadcast %457 : f32 to vector<8x16xf32>
    %459 = arith.mulf %458, %448 : vector<8x16xf32>
    %460 = arith.addf %442, %459 : vector<8x16xf32>
    %c131 = arith.constant 131 : index
    %461 = memref.load %arg5[%c131] : memref<144xf32, #tpu.memory_space<smem>>
    %462 = vector.broadcast %461 : f32 to vector<8x16xf32>
    %463 = arith.mulf %462, %448 : vector<8x16xf32>
    %464 = arith.addf %446, %463 : vector<8x16xf32>
    %c2_100 = arith.constant 2 : index
    %c2_101 = arith.constant 2 : index
    %c0_102 = arith.constant 0 : index
    %465 = vector.load %arg10[%c2_100, %c2_101, %c0_102] : memref<4x10x18xf32, #tpu.memory_space<vmem>>, vector<1x8x16xf32>
    %466 = vector.shape_cast %465 : vector<1x8x16xf32> to vector<8x16xf32>
    %c24 = arith.constant 24 : index
    %467 = memref.load %arg5[%c24] : memref<144xf32, #tpu.memory_space<smem>>
    %468 = vector.broadcast %467 : f32 to vector<8x16xf32>
    %469 = arith.mulf %468, %466 : vector<8x16xf32>
    %470 = arith.addf %452, %469 : vector<8x16xf32>
    %c60 = arith.constant 60 : index
    %471 = memref.load %arg5[%c60] : memref<144xf32, #tpu.memory_space<smem>>
    %472 = vector.broadcast %471 : f32 to vector<8x16xf32>
    %473 = arith.mulf %472, %466 : vector<8x16xf32>
    %474 = arith.addf %456, %473 : vector<8x16xf32>
    %c96 = arith.constant 96 : index
    %475 = memref.load %arg5[%c96] : memref<144xf32, #tpu.memory_space<smem>>
    %476 = vector.broadcast %475 : f32 to vector<8x16xf32>
    %477 = arith.mulf %476, %466 : vector<8x16xf32>
    %478 = arith.addf %460, %477 : vector<8x16xf32>
    %c132 = arith.constant 132 : index
    %479 = memref.load %arg5[%c132] : memref<144xf32, #tpu.memory_space<smem>>
    %480 = vector.broadcast %479 : f32 to vector<8x16xf32>
    %481 = arith.mulf %480, %466 : vector<8x16xf32>
    %482 = arith.addf %464, %481 : vector<8x16xf32>
    %c2_103 = arith.constant 2 : index
    %c2_104 = arith.constant 2 : index
    %c1_105 = arith.constant 1 : index
    %483 = vector.load %arg10[%c2_103, %c2_104, %c1_105] : memref<4x10x18xf32, #tpu.memory_space<vmem>>, vector<1x8x16xf32>
    %484 = vector.shape_cast %483 : vector<1x8x16xf32> to vector<8x16xf32>
    %c25 = arith.constant 25 : index
    %485 = memref.load %arg5[%c25] : memref<144xf32, #tpu.memory_space<smem>>
    %486 = vector.broadcast %485 : f32 to vector<8x16xf32>
    %487 = arith.mulf %486, %484 : vector<8x16xf32>
    %488 = arith.addf %470, %487 : vector<8x16xf32>
    %c61 = arith.constant 61 : index
    %489 = memref.load %arg5[%c61] : memref<144xf32, #tpu.memory_space<smem>>
    %490 = vector.broadcast %489 : f32 to vector<8x16xf32>
    %491 = arith.mulf %490, %484 : vector<8x16xf32>
    %492 = arith.addf %474, %491 : vector<8x16xf32>
    %c97 = arith.constant 97 : index
    %493 = memref.load %arg5[%c97] : memref<144xf32, #tpu.memory_space<smem>>
    %494 = vector.broadcast %493 : f32 to vector<8x16xf32>
    %495 = arith.mulf %494, %484 : vector<8x16xf32>
    %496 = arith.addf %478, %495 : vector<8x16xf32>
    %c133 = arith.constant 133 : index
    %497 = memref.load %arg5[%c133] : memref<144xf32, #tpu.memory_space<smem>>
    %498 = vector.broadcast %497 : f32 to vector<8x16xf32>
    %499 = arith.mulf %498, %484 : vector<8x16xf32>
    %500 = arith.addf %482, %499 : vector<8x16xf32>
    %c2_106 = arith.constant 2 : index
    %c2_107 = arith.constant 2 : index
    %c2_108 = arith.constant 2 : index
    %501 = vector.load %arg10[%c2_106, %c2_107, %c2_108] : memref<4x10x18xf32, #tpu.memory_space<vmem>>, vector<1x8x16xf32>
    %502 = vector.shape_cast %501 : vector<1x8x16xf32> to vector<8x16xf32>
    %c26 = arith.constant 26 : index
    %503 = memref.load %arg5[%c26] : memref<144xf32, #tpu.memory_space<smem>>
    %504 = vector.broadcast %503 : f32 to vector<8x16xf32>
    %505 = arith.mulf %504, %502 : vector<8x16xf32>
    %506 = arith.addf %488, %505 : vector<8x16xf32>
    %c62 = arith.constant 62 : index
    %507 = memref.load %arg5[%c62] : memref<144xf32, #tpu.memory_space<smem>>
    %508 = vector.broadcast %507 : f32 to vector<8x16xf32>
    %509 = arith.mulf %508, %502 : vector<8x16xf32>
    %510 = arith.addf %492, %509 : vector<8x16xf32>
    %c98 = arith.constant 98 : index
    %511 = memref.load %arg5[%c98] : memref<144xf32, #tpu.memory_space<smem>>
    %512 = vector.broadcast %511 : f32 to vector<8x16xf32>
    %513 = arith.mulf %512, %502 : vector<8x16xf32>
    %514 = arith.addf %496, %513 : vector<8x16xf32>
    %c134 = arith.constant 134 : index
    %515 = memref.load %arg5[%c134] : memref<144xf32, #tpu.memory_space<smem>>
    %516 = vector.broadcast %515 : f32 to vector<8x16xf32>
    %517 = arith.mulf %516, %502 : vector<8x16xf32>
    %518 = arith.addf %500, %517 : vector<8x16xf32>
    %c3_109 = arith.constant 3 : index
    %c0_110 = arith.constant 0 : index
    %c0_111 = arith.constant 0 : index
    %519 = vector.load %arg10[%c3_109, %c0_110, %c0_111] : memref<4x10x18xf32, #tpu.memory_space<vmem>>, vector<1x8x16xf32>
    %520 = vector.shape_cast %519 : vector<1x8x16xf32> to vector<8x16xf32>
    %c27 = arith.constant 27 : index
    %521 = memref.load %arg5[%c27] : memref<144xf32, #tpu.memory_space<smem>>
    %522 = vector.broadcast %521 : f32 to vector<8x16xf32>
    %523 = arith.mulf %522, %520 : vector<8x16xf32>
    %524 = arith.addf %506, %523 : vector<8x16xf32>
    %c63 = arith.constant 63 : index
    %525 = memref.load %arg5[%c63] : memref<144xf32, #tpu.memory_space<smem>>
    %526 = vector.broadcast %525 : f32 to vector<8x16xf32>
    %527 = arith.mulf %526, %520 : vector<8x16xf32>
    %528 = arith.addf %510, %527 : vector<8x16xf32>
    %c99 = arith.constant 99 : index
    %529 = memref.load %arg5[%c99] : memref<144xf32, #tpu.memory_space<smem>>
    %530 = vector.broadcast %529 : f32 to vector<8x16xf32>
    %531 = arith.mulf %530, %520 : vector<8x16xf32>
    %532 = arith.addf %514, %531 : vector<8x16xf32>
    %c135 = arith.constant 135 : index
    %533 = memref.load %arg5[%c135] : memref<144xf32, #tpu.memory_space<smem>>
    %534 = vector.broadcast %533 : f32 to vector<8x16xf32>
    %535 = arith.mulf %534, %520 : vector<8x16xf32>
    %536 = arith.addf %518, %535 : vector<8x16xf32>
    %c3_112 = arith.constant 3 : index
    %c0_113 = arith.constant 0 : index
    %c1_114 = arith.constant 1 : index
    %537 = vector.load %arg10[%c3_112, %c0_113, %c1_114] : memref<4x10x18xf32, #tpu.memory_space<vmem>>, vector<1x8x16xf32>
    %538 = vector.shape_cast %537 : vector<1x8x16xf32> to vector<8x16xf32>
    %c28 = arith.constant 28 : index
    %539 = memref.load %arg5[%c28] : memref<144xf32, #tpu.memory_space<smem>>
    %540 = vector.broadcast %539 : f32 to vector<8x16xf32>
    %541 = arith.mulf %540, %538 : vector<8x16xf32>
    %542 = arith.addf %524, %541 : vector<8x16xf32>
    %c64 = arith.constant 64 : index
    %543 = memref.load %arg5[%c64] : memref<144xf32, #tpu.memory_space<smem>>
    %544 = vector.broadcast %543 : f32 to vector<8x16xf32>
    %545 = arith.mulf %544, %538 : vector<8x16xf32>
    %546 = arith.addf %528, %545 : vector<8x16xf32>
    %c100 = arith.constant 100 : index
    %547 = memref.load %arg5[%c100] : memref<144xf32, #tpu.memory_space<smem>>
    %548 = vector.broadcast %547 : f32 to vector<8x16xf32>
    %549 = arith.mulf %548, %538 : vector<8x16xf32>
    %550 = arith.addf %532, %549 : vector<8x16xf32>
    %c136 = arith.constant 136 : index
    %551 = memref.load %arg5[%c136] : memref<144xf32, #tpu.memory_space<smem>>
    %552 = vector.broadcast %551 : f32 to vector<8x16xf32>
    %553 = arith.mulf %552, %538 : vector<8x16xf32>
    %554 = arith.addf %536, %553 : vector<8x16xf32>
    %c3_115 = arith.constant 3 : index
    %c0_116 = arith.constant 0 : index
    %c2_117 = arith.constant 2 : index
    %555 = vector.load %arg10[%c3_115, %c0_116, %c2_117] : memref<4x10x18xf32, #tpu.memory_space<vmem>>, vector<1x8x16xf32>
    %556 = vector.shape_cast %555 : vector<1x8x16xf32> to vector<8x16xf32>
    %c29 = arith.constant 29 : index
    %557 = memref.load %arg5[%c29] : memref<144xf32, #tpu.memory_space<smem>>
    %558 = vector.broadcast %557 : f32 to vector<8x16xf32>
    %559 = arith.mulf %558, %556 : vector<8x16xf32>
    %560 = arith.addf %542, %559 : vector<8x16xf32>
    %c65 = arith.constant 65 : index
    %561 = memref.load %arg5[%c65] : memref<144xf32, #tpu.memory_space<smem>>
    %562 = vector.broadcast %561 : f32 to vector<8x16xf32>
    %563 = arith.mulf %562, %556 : vector<8x16xf32>
    %564 = arith.addf %546, %563 : vector<8x16xf32>
    %c101 = arith.constant 101 : index
    %565 = memref.load %arg5[%c101] : memref<144xf32, #tpu.memory_space<smem>>
    %566 = vector.broadcast %565 : f32 to vector<8x16xf32>
    %567 = arith.mulf %566, %556 : vector<8x16xf32>
    %568 = arith.addf %550, %567 : vector<8x16xf32>
    %c137 = arith.constant 137 : index
    %569 = memref.load %arg5[%c137] : memref<144xf32, #tpu.memory_space<smem>>
    %570 = vector.broadcast %569 : f32 to vector<8x16xf32>
    %571 = arith.mulf %570, %556 : vector<8x16xf32>
    %572 = arith.addf %554, %571 : vector<8x16xf32>
    %c3_118 = arith.constant 3 : index
    %c1_119 = arith.constant 1 : index
    %c0_120 = arith.constant 0 : index
    %573 = vector.load %arg10[%c3_118, %c1_119, %c0_120] : memref<4x10x18xf32, #tpu.memory_space<vmem>>, vector<1x8x16xf32>
    %574 = vector.shape_cast %573 : vector<1x8x16xf32> to vector<8x16xf32>
    %c30 = arith.constant 30 : index
    %575 = memref.load %arg5[%c30] : memref<144xf32, #tpu.memory_space<smem>>
    %576 = vector.broadcast %575 : f32 to vector<8x16xf32>
    %577 = arith.mulf %576, %574 : vector<8x16xf32>
    %578 = arith.addf %560, %577 : vector<8x16xf32>
    %c66 = arith.constant 66 : index
    %579 = memref.load %arg5[%c66] : memref<144xf32, #tpu.memory_space<smem>>
    %580 = vector.broadcast %579 : f32 to vector<8x16xf32>
    %581 = arith.mulf %580, %574 : vector<8x16xf32>
    %582 = arith.addf %564, %581 : vector<8x16xf32>
    %c102 = arith.constant 102 : index
    %583 = memref.load %arg5[%c102] : memref<144xf32, #tpu.memory_space<smem>>
    %584 = vector.broadcast %583 : f32 to vector<8x16xf32>
    %585 = arith.mulf %584, %574 : vector<8x16xf32>
    %586 = arith.addf %568, %585 : vector<8x16xf32>
    %c138 = arith.constant 138 : index
    %587 = memref.load %arg5[%c138] : memref<144xf32, #tpu.memory_space<smem>>
    %588 = vector.broadcast %587 : f32 to vector<8x16xf32>
    %589 = arith.mulf %588, %574 : vector<8x16xf32>
    %590 = arith.addf %572, %589 : vector<8x16xf32>
    %c3_121 = arith.constant 3 : index
    %c1_122 = arith.constant 1 : index
    %c1_123 = arith.constant 1 : index
    %591 = vector.load %arg10[%c3_121, %c1_122, %c1_123] : memref<4x10x18xf32, #tpu.memory_space<vmem>>, vector<1x8x16xf32>
    %592 = vector.shape_cast %591 : vector<1x8x16xf32> to vector<8x16xf32>
    %c31 = arith.constant 31 : index
    %593 = memref.load %arg5[%c31] : memref<144xf32, #tpu.memory_space<smem>>
    %594 = vector.broadcast %593 : f32 to vector<8x16xf32>
    %595 = arith.mulf %594, %592 : vector<8x16xf32>
    %596 = arith.addf %578, %595 : vector<8x16xf32>
    %c67 = arith.constant 67 : index
    %597 = memref.load %arg5[%c67] : memref<144xf32, #tpu.memory_space<smem>>
    %598 = vector.broadcast %597 : f32 to vector<8x16xf32>
    %599 = arith.mulf %598, %592 : vector<8x16xf32>
    %600 = arith.addf %582, %599 : vector<8x16xf32>
    %c103 = arith.constant 103 : index
    %601 = memref.load %arg5[%c103] : memref<144xf32, #tpu.memory_space<smem>>
    %602 = vector.broadcast %601 : f32 to vector<8x16xf32>
    %603 = arith.mulf %602, %592 : vector<8x16xf32>
    %604 = arith.addf %586, %603 : vector<8x16xf32>
    %c139 = arith.constant 139 : index
    %605 = memref.load %arg5[%c139] : memref<144xf32, #tpu.memory_space<smem>>
    %606 = vector.broadcast %605 : f32 to vector<8x16xf32>
    %607 = arith.mulf %606, %592 : vector<8x16xf32>
    %608 = arith.addf %590, %607 : vector<8x16xf32>
    %c3_124 = arith.constant 3 : index
    %c1_125 = arith.constant 1 : index
    %c2_126 = arith.constant 2 : index
    %609 = vector.load %arg10[%c3_124, %c1_125, %c2_126] : memref<4x10x18xf32, #tpu.memory_space<vmem>>, vector<1x8x16xf32>
    %610 = vector.shape_cast %609 : vector<1x8x16xf32> to vector<8x16xf32>
    %c32 = arith.constant 32 : index
    %611 = memref.load %arg5[%c32] : memref<144xf32, #tpu.memory_space<smem>>
    %612 = vector.broadcast %611 : f32 to vector<8x16xf32>
    %613 = arith.mulf %612, %610 : vector<8x16xf32>
    %614 = arith.addf %596, %613 : vector<8x16xf32>
    %c68 = arith.constant 68 : index
    %615 = memref.load %arg5[%c68] : memref<144xf32, #tpu.memory_space<smem>>
    %616 = vector.broadcast %615 : f32 to vector<8x16xf32>
    %617 = arith.mulf %616, %610 : vector<8x16xf32>
    %618 = arith.addf %600, %617 : vector<8x16xf32>
    %c104 = arith.constant 104 : index
    %619 = memref.load %arg5[%c104] : memref<144xf32, #tpu.memory_space<smem>>
    %620 = vector.broadcast %619 : f32 to vector<8x16xf32>
    %621 = arith.mulf %620, %610 : vector<8x16xf32>
    %622 = arith.addf %604, %621 : vector<8x16xf32>
    %c140 = arith.constant 140 : index
    %623 = memref.load %arg5[%c140] : memref<144xf32, #tpu.memory_space<smem>>
    %624 = vector.broadcast %623 : f32 to vector<8x16xf32>
    %625 = arith.mulf %624, %610 : vector<8x16xf32>
    %626 = arith.addf %608, %625 : vector<8x16xf32>
    %c3_127 = arith.constant 3 : index
    %c2_128 = arith.constant 2 : index
    %c0_129 = arith.constant 0 : index
    %627 = vector.load %arg10[%c3_127, %c2_128, %c0_129] : memref<4x10x18xf32, #tpu.memory_space<vmem>>, vector<1x8x16xf32>
    %628 = vector.shape_cast %627 : vector<1x8x16xf32> to vector<8x16xf32>
    %c33 = arith.constant 33 : index
    %629 = memref.load %arg5[%c33] : memref<144xf32, #tpu.memory_space<smem>>
    %630 = vector.broadcast %629 : f32 to vector<8x16xf32>
    %631 = arith.mulf %630, %628 : vector<8x16xf32>
    %632 = arith.addf %614, %631 : vector<8x16xf32>
    %c69 = arith.constant 69 : index
    %633 = memref.load %arg5[%c69] : memref<144xf32, #tpu.memory_space<smem>>
    %634 = vector.broadcast %633 : f32 to vector<8x16xf32>
    %635 = arith.mulf %634, %628 : vector<8x16xf32>
    %636 = arith.addf %618, %635 : vector<8x16xf32>
    %c105 = arith.constant 105 : index
    %637 = memref.load %arg5[%c105] : memref<144xf32, #tpu.memory_space<smem>>
    %638 = vector.broadcast %637 : f32 to vector<8x16xf32>
    %639 = arith.mulf %638, %628 : vector<8x16xf32>
    %640 = arith.addf %622, %639 : vector<8x16xf32>
    %c141 = arith.constant 141 : index
    %641 = memref.load %arg5[%c141] : memref<144xf32, #tpu.memory_space<smem>>
    %642 = vector.broadcast %641 : f32 to vector<8x16xf32>
    %643 = arith.mulf %642, %628 : vector<8x16xf32>
    %644 = arith.addf %626, %643 : vector<8x16xf32>
    %c3_130 = arith.constant 3 : index
    %c2_131 = arith.constant 2 : index
    %c1_132 = arith.constant 1 : index
    %645 = vector.load %arg10[%c3_130, %c2_131, %c1_132] : memref<4x10x18xf32, #tpu.memory_space<vmem>>, vector<1x8x16xf32>
    %646 = vector.shape_cast %645 : vector<1x8x16xf32> to vector<8x16xf32>
    %c34 = arith.constant 34 : index
    %647 = memref.load %arg5[%c34] : memref<144xf32, #tpu.memory_space<smem>>
    %648 = vector.broadcast %647 : f32 to vector<8x16xf32>
    %649 = arith.mulf %648, %646 : vector<8x16xf32>
    %650 = arith.addf %632, %649 : vector<8x16xf32>
    %c70 = arith.constant 70 : index
    %651 = memref.load %arg5[%c70] : memref<144xf32, #tpu.memory_space<smem>>
    %652 = vector.broadcast %651 : f32 to vector<8x16xf32>
    %653 = arith.mulf %652, %646 : vector<8x16xf32>
    %654 = arith.addf %636, %653 : vector<8x16xf32>
    %c106 = arith.constant 106 : index
    %655 = memref.load %arg5[%c106] : memref<144xf32, #tpu.memory_space<smem>>
    %656 = vector.broadcast %655 : f32 to vector<8x16xf32>
    %657 = arith.mulf %656, %646 : vector<8x16xf32>
    %658 = arith.addf %640, %657 : vector<8x16xf32>
    %c142 = arith.constant 142 : index
    %659 = memref.load %arg5[%c142] : memref<144xf32, #tpu.memory_space<smem>>
    %660 = vector.broadcast %659 : f32 to vector<8x16xf32>
    %661 = arith.mulf %660, %646 : vector<8x16xf32>
    %662 = arith.addf %644, %661 : vector<8x16xf32>
    %c3_133 = arith.constant 3 : index
    %c2_134 = arith.constant 2 : index
    %c2_135 = arith.constant 2 : index
    %663 = vector.load %arg10[%c3_133, %c2_134, %c2_135] : memref<4x10x18xf32, #tpu.memory_space<vmem>>, vector<1x8x16xf32>
    %664 = vector.shape_cast %663 : vector<1x8x16xf32> to vector<8x16xf32>
    %c35 = arith.constant 35 : index
    %665 = memref.load %arg5[%c35] : memref<144xf32, #tpu.memory_space<smem>>
    %666 = vector.broadcast %665 : f32 to vector<8x16xf32>
    %667 = arith.mulf %666, %664 : vector<8x16xf32>
    %668 = arith.addf %650, %667 : vector<8x16xf32>
    %c71 = arith.constant 71 : index
    %669 = memref.load %arg5[%c71] : memref<144xf32, #tpu.memory_space<smem>>
    %670 = vector.broadcast %669 : f32 to vector<8x16xf32>
    %671 = arith.mulf %670, %664 : vector<8x16xf32>
    %672 = arith.addf %654, %671 : vector<8x16xf32>
    %c107 = arith.constant 107 : index
    %673 = memref.load %arg5[%c107] : memref<144xf32, #tpu.memory_space<smem>>
    %674 = vector.broadcast %673 : f32 to vector<8x16xf32>
    %675 = arith.mulf %674, %664 : vector<8x16xf32>
    %676 = arith.addf %658, %675 : vector<8x16xf32>
    %c143 = arith.constant 143 : index
    %677 = memref.load %arg5[%c143] : memref<144xf32, #tpu.memory_space<smem>>
    %678 = vector.broadcast %677 : f32 to vector<8x16xf32>
    %679 = arith.mulf %678, %664 : vector<8x16xf32>
    %680 = arith.addf %662, %679 : vector<8x16xf32>
    %c0_136 = arith.constant 0 : index
    %681 = memref.load %arg8[%c0_136] : memref<1xf32, #tpu.memory_space<smem>>
    %682 = vector.broadcast %681 : f32 to vector<8x16xf32>
    %c0_137 = arith.constant 0 : index
    %683 = memref.load %arg7[%c0_137] : memref<4xf32, #tpu.memory_space<smem>>
    %cst_138 = arith.constant 0.000000e+00 : f32
    %684 = vector.broadcast %cst_138 : f32 to vector<8x16xf32>
    %685 = arith.maximumf %668, %684 : vector<8x16xf32>
    %686 = vector.broadcast %683 : f32 to vector<8x16xf32>
    %687 = arith.mulf %686, %685 : vector<8x16xf32>
    %688 = arith.addf %682, %687 : vector<8x16xf32>
    %c1_139 = arith.constant 1 : index
    %689 = memref.load %arg7[%c1_139] : memref<4xf32, #tpu.memory_space<smem>>
    %cst_140 = arith.constant 0.000000e+00 : f32
    %690 = vector.broadcast %cst_140 : f32 to vector<8x16xf32>
    %691 = arith.maximumf %672, %690 : vector<8x16xf32>
    %692 = vector.broadcast %689 : f32 to vector<8x16xf32>
    %693 = arith.mulf %692, %691 : vector<8x16xf32>
    %694 = arith.addf %688, %693 : vector<8x16xf32>
    %c2_141 = arith.constant 2 : index
    %695 = memref.load %arg7[%c2_141] : memref<4xf32, #tpu.memory_space<smem>>
    %cst_142 = arith.constant 0.000000e+00 : f32
    %696 = vector.broadcast %cst_142 : f32 to vector<8x16xf32>
    %697 = arith.maximumf %676, %696 : vector<8x16xf32>
    %698 = vector.broadcast %695 : f32 to vector<8x16xf32>
    %699 = arith.mulf %698, %697 : vector<8x16xf32>
    %700 = arith.addf %694, %699 : vector<8x16xf32>
    %c3_143 = arith.constant 3 : index
    %701 = memref.load %arg7[%c3_143] : memref<4xf32, #tpu.memory_space<smem>>
    %cst_144 = arith.constant 0.000000e+00 : f32
    %702 = vector.broadcast %cst_144 : f32 to vector<8x16xf32>
    %703 = arith.maximumf %680, %702 : vector<8x16xf32>
    %704 = vector.broadcast %701 : f32 to vector<8x16xf32>
    %705 = arith.mulf %704, %703 : vector<8x16xf32>
    %706 = arith.addf %700, %705 : vector<8x16xf32>
    %c0_145 = arith.constant 0 : index
    %c0_146 = arith.constant 0 : index
    %c0_147 = arith.constant 0 : index
    %707 = vector.load %arg9[%c0_145, %c0_146, %c0_147] : memref<1x8x16xf32, #tpu.memory_space<vmem>>, vector<1x8x16xf32>
    %708 = vector.shape_cast %707 : vector<1x8x16xf32> to vector<8x16xf32>
    %709 = vector.shape_cast %706 : vector<8x16xf32> to vector<1x8x16xf32>
    tpu.vector_store %arg9[%c0_145, %c0_146, %c0_147], %709 {strides = array<i32>} : memref<1x8x16xf32, #tpu.memory_space<vmem>>, vector<1x8x16xf32>,
    return
  }
  func.func @transform_0(%arg0: i32, %arg1: i32) -> (i32, i32, i32, i32) {
    %c0_i32 = arith.constant 0 : i32
    %c0_i32_0 = arith.constant 0 : i32
    %c0_i32_1 = arith.constant 0 : i32
    return %arg0, %c0_i32, %arg1, %c0_i32_0 : i32, i32, i32, i32
  }
  func.func @transform_1(%arg0: i32, %arg1: i32) -> (i32, i32, i32, i32) {
    %c1_i32 = arith.constant 1 : i32
    %0 = arith.muli %arg1, %c1_i32 : i32
    %c1_i32_0 = arith.constant 1 : i32
    %1 = arith.subi %0, %c1_i32_0 : i32
    %c0_i32 = arith.constant 0 : i32
    %2 = arith.maxsi %1, %c0_i32 : i32
    %c0_i32_1 = arith.constant 0 : i32
    %c0_i32_2 = arith.constant 0 : i32
    %c0_i32_3 = arith.constant 0 : i32
    return %arg0, %c0_i32_1, %2, %c0_i32_2 : i32, i32, i32, i32
  }
  func.func @transform_2(%arg0: i32, %arg1: i32) -> (i32, i32, i32, i32) {
    %c1_i32 = arith.constant 1 : i32
    %0 = arith.addi %arg1, %c1_i32 : i32
    %c1_i32_0 = arith.constant 1 : i32
    %1 = arith.muli %0, %c1_i32_0 : i32
    %c1_i32_1 = arith.constant 1 : i32
    %2 = arith.minsi %1, %c1_i32_1 : i32
    %c0_i32 = arith.constant 0 : i32
    %c0_i32_2 = arith.constant 0 : i32
    %c0_i32_3 = arith.constant 0 : i32
    return %arg0, %c0_i32, %2, %c0_i32_2 : i32, i32, i32, i32
  }
  func.func @transform_3(%arg0: i32, %arg1: i32) -> i32 {
    %c0_i32 = arith.constant 0 : i32
    %c0_i32_0 = arith.constant 0 : i32
    return %c0_i32 : i32
  }
  func.func @transform_4(%arg0: i32, %arg1: i32) -> i32 {
    %c0_i32 = arith.constant 0 : i32
    %c0_i32_0 = arith.constant 0 : i32
    return %c0_i32 : i32
  }
  func.func @transform_5(%arg0: i32, %arg1: i32) -> i32 {
    %c0_i32 = arith.constant 0 : i32
    %c0_i32_0 = arith.constant 0 : i32
    return %c0_i32 : i32
  }
  func.func @transform_6(%arg0: i32, %arg1: i32) -> i32 {
    %c0_i32 = arith.constant 0 : i32
    %c0_i32_0 = arith.constant 0 : i32
    return %c0_i32 : i32
  }
  func.func @transform_7(%arg0: i32, %arg1: i32) -> (i32, i32, i32) {
    %c0_i32 = arith.constant 0 : i32
    %c0_i32_0 = arith.constant 0 : i32
    return %arg0, %arg1, %c0_i32 : i32, i32, i32
  }
}

</mosaic_0001>

<bundles_post_ra>
// kernel: detail_head_forward.1
= control target key start
LH: loop header
LB: loop body
LE: loop exit
PB: predicated region body
PF: predicated region fallthrough
CT: control target
= control target key end

     0   :  { %s3190_s0 = inlined_call_operand.vmem [shape: f32[2,4,16,16], index: 0, kind: input, shape index: {}, may-alias: {0,1,2}]   ;;  %s3191_s1 = inlined_call_operand.vmem [shape: f32[2,4,16,16], index: 1, kind: input, shape index: {}, may-alias: {0,1,2}]   ;;  %s3192_s2 = inlined_call_operand.vmem [shape: f32[2,4,16,16], index: 2, kind: input, shape index: {}, may-alias: {0,1,2}]   ;;  %s3193_s3 = inlined_call_operand.vmem [shape: f32[144], index: 3, kind: input, shape index: {}]   ;;  %s3194_s4 = inlined_call_operand.vmem [shape: f32[4], index: 4, kind: input, shape index: {}]   ;;  %s3195_s5 = inlined_call_operand.vmem [shape: f32[4], index: 5, kind: input, shape index: {}]   ;;  %s3196_s6 = inlined_call_operand.<no memory space> [shape: f32[1], index: 6, kind: input, shape index: {}]   ;;  %s3197_s7 = inlined_call_operand.hbm [shape: f32[2,16,16], index: 7, kind: output, shape index: {}]  }
   0x1   :  { %3207 = sst [smem:[#allocation24_spill]] %s3190_s0 }
   0x2   :  { %3208 = sst [smem:[#allocation25_spill]] %s3193_s3 }
   0x3   :  { %3209 = sst [smem:[#allocation26_spill]] %s3194_s4 }
   0x4   :  { %3210 = sst [smem:[#allocation27_spill]] %s3195_s5 }
   0x5   :  { %3211 = sst [smem:[#allocation28_spill]] %s3197_s7 }
   0x6   :  { %12 = sst [smem:[#allocation3]] %s3196_s6 }
   0x7   :  { %13 = vsyncpa [#allocation9], 0 }
   0x8   :  { %14 = vsyncpa [#allocation11], 0 }
   0x9   :  { %15 = vsyncpa [#allocation8], 0 }
   0xa   :  { %17 = vsyncpa [#allocation8 + $0x1], 0  ;;  %s2377_s26 = smov 0   ;;  %s2379_s27 = smov 0  }
   0xb   :  { %s2381_s28 = smov 0   ;;  %s2383_s29 = smov 0  }
   0xc   :  { %s2385_s30 = smov 0   ;;  %s2387_s8 = smov 0  }
   0xd   :  { %s2389_s9 = smov 0   ;;  %s2391_s10 = smov 0  }
   0xe   :  { %s2393_s6 = smov 0   ;;  %s2395_s11 = smov 0  }
   0xf   :  { %s2397_s12 = smov 0   ;;  %s2399_s13 = smov 0  }
  0x10 LB: > { %3212 = sst [smem:[#allocation17_spill]] %s2280_s26  ;;  %s1823_s15 = sadd.s32 4294967294, %s2324_s13   ;;  %s2324_s13 = sphi %s2399_s13, %s23_s13   ;;  %s2320_s12 = sphi %s2397_s12, %s3258_s12   ;;  %s2316_s11 = sphi %s2395_s11, %s3257_s11   ;;  %s2312_s6 = sphi %s2393_s6, %s3256_s6   ;;  %s2308_s10 = sphi %s2391_s10, %s3255_s10   ;;  %s2304_s9 = sphi %s2389_s9, %s3254_s9   ;;  %s2300_s8 = sphi %s2387_s8, %s3253_s8   ;;  %s2296_s30 = sphi %s2385_s30, %s3252_s30   ;;  %s2292_s29 = sphi %s2383_s29, %s3251_s29   ;;  %s2288_s28 = sphi %s2381_s28, %s3250_s28   ;;  %s2284_s27 = sphi %s2379_s27, %s3249_s27   ;;  %s2280_s26 = sphi %s2377_s26, %s3248_s26  }
  0x11   : > { %s32_s16 = sadd.s32 1, %s2316_s11  ;;  %s35_s17 = sadd.s32 1, %s2320_s12 }
  0x12   : > { %p33_p0 = scmp.ge.s32.totalorder %s32_s16, 2  ;;  %s44_s18 = sadd.s32 1, %s2304_s9 }
  0x13   : > { %p51_p1 = scmp.ne.s32.totalorder %s2304_s9, %s2300_s8  ;;  %p52_p2 = scmp.eq.s32.totalorder %s2324_s13, 0 }
  0x14   : > { %s3260_s16 = smov (%p33_p0, %s32_s16), 0  ;;  %s3262_s17 = smov (!%p33_p0, %s35_s17), %s2320_s12 }
  0x15   : > { %3213 = sst [smem:[#allocation18_spill]] %s3260_s16  ;;  %s40_s19 = ssub.s32 %s2316_s11, %s3260_s16 }
  0x16   : > { %p2455_p3 = por %p52_p2, %p51_p1  ;;  %p37_p4 = scmp.ge.s32.totalorder %s3262_s17, 2 }
  0x17   : > { %s78_s23 = sadd.s32 1, %s2296_s30  ;;  %p85_p6 = scmp.ne.s32.totalorder %s2296_s30, %s2292_s29 }
  0x18   : > { %s3214_s20 = scalar_select %p2455_p3, 1, 0 }
  0x19   : > { %s3264_s17 = smov (%p37_p4, %s3262_s17), 0  ;;  %p2471_p7 = por %p85_p6, %p52_p2 }
  0x1a   : > { %3215 = sst [smem:[#allocation19_spill]] %s3264_s17  ;;  %s39_s21 = ssub.s32 %s2320_s12, %s3264_s17 }
  0x1b   : > { %s41_s22 = sor.u32 %s40_s19, %s39_s21  ;;  %p76_p8 = scmp.eq.s32.totalorder %s39_s21, 0 }
  0x1c   : > { %p42_p5 = scmp.eq.s32.totalorder %s41_s22, 0  ;;  %s112_s16 = sadd.s32 1, %s2288_s28 }
  0x1d   : > { %s3217_s25 = scalar_select %p2471_p7, 1, 0 }
  0x1e   : > { %s2467_s24 = scalar_select %p42_p5, %s2304_s9, %s44_s18  }
  0x1f   : > { %s2476_s14 = scalar_select %p76_p8, %s2296_s30, %s78_s23  }
  0x20   : > { %3216 = sst [smem:[#allocation20_spill]] %s2467_s24  ;;  %p119_p9 = scmp.ne.s32.totalorder %s2288_s28, %s2284_s27 }
  0x21   : > { %3218 = sst [smem:[#allocation21_spill]] %s2476_s14  ;;  %s3219_s17 = sadd.s32 4294967295, %s2324_s13  }
  0x22   : > { %p235_p10 = scmp.eq.s32.totalorder %s3219_s17, 3  ;;  %p2485_p11 = por %p119_p9, %p52_p2 }
  0x23   : > { %p240_p13 = scmp.ne.s32.totalorder %s2300_s8, %s2280_s26  ;;  %p241_p0 = scmp.eq.s32.totalorder %s1823_s15, 3 }
  0x24   : > { %s3220_s19 = scalar_select %p2485_p11, 1, 0 }
  0x25   : > { %p2492_p12 = por %p235_p10, %p51_p1  ;;  %p1826_p4 = scmp.ge.s32.totalorder %s2324_s13, 1 }
  0x26   : > { %p2499_p5 = por %p241_p0, %p240_p13  ;;  %p248_p6 = scmp.lt.s32.totalorder %s2324_s13, 5 }
  0x27   : > { %s3221_s18 = scalar_select %p2492_p12, 1, 0 }
  0x28   : > { %s3222_s21 = scalar_select %p2499_p5, 1, 0 }
  0x29   : > { %s2505_s22 = scalar_select %p76_p8, %s2288_s28, %s112_s16  }
  0x2a   : > { %3223 = sst [smem:[#allocation22_spill]] %s3222_s21  ;;  %p2507_p7 = pnand %p1826_p4, %p248_p6 }
  0x2b   : > { %3224 = sst [smem:[#allocation23_spill]] %s2505_s22  ;;  %s3226_s23 = sadd.s32 4294967295, %s2324_s13  }
  0x2c   : > { %s3225_s17 = scalar_select %p2507_p7, 1, 0 }
  0x2d   : > { %p2513_p1 = scmp.eq.s32.totalorder %s3226_s23, 0  ;;  %s3228_s4 = sld [smem:[#allocation26_spill]] }
  0x2e   : > { %p2017_p2 = pneg %p2507_p7  ;;  %s3230_s3 = sld [smem:[#allocation25_spill]] }
  0x2f   : > { %s3227_s24 = scalar_select %p2513_p1, 1, 0 }
  0x30   : > { %p2524_p8 = pnand %p2513_p1, %p2017_p2 }
  0x32   : > { %p2145_p10 = pneg %p2524_p8 }
  0x33   : > { %s272_s26 = sshll.u32 %s3228_s4, 4  ;;  %s273_s26 = int_to_ptr.vmem [resolvable:$true] %s272_s26 }
  0x34   : > { %s261_s23 = sshll.u32 %s3230_s3, 4  ;;  %s2143_s7 = scalar_lea.vmem %s273_s26, 16  ;;  %s262_s23 = int_to_ptr.vmem [resolvable:$true] %s261_s23 }
  0x35   : > { %p2144_p9 = scmp.ne.s32.totalorder %s273_s26, %s2143_s7  ;;  %p2151_p4 = scmp.lt.s32.totalorder %s273_s26, %s273_s26 }
  0x36   : > { %p2152_p6 = scmp.lt.s32.totalorder %s2143_s7, %s2143_s7 }
  0x37   : > { %p2146_p13 = pnand %p2145_p10, %p2144_p9 }
  0x38   : > { %p2153_p2 = por %p2152_p6, %p2151_p4 }
  0x39   : > { %p2147_p0 = pneg %p2146_p13 }
  0x3b   : > { %p2154_p5 = pnand %p2153_p2, %p2147_p0 }
  0x3d   : > { %2157 = shalt.err (!%p2154_p5)
}
  0x3e   : > { %s2326_s14 = smov [#allocation10]   ;;  %s2158_s21 = scalar_lea.vmem %s262_s23, 32 }
  0x3f   : > { %2023 = dma.vmem_to_smem (!%p2524_p8), %s273_s26, 16, %s2326_s14, [#allocation11]  }
  0x40   : > { %p2159_p12 = scmp.ne.s32.totalorder %s262_s23, %s2158_s21  ;;  %p2166_p11 = scmp.lt.s32.totalorder %s262_s23, %s262_s23 }
  0x41   : > { %p2167_p9 = scmp.lt.s32.totalorder %s2158_s21, %s2158_s21 }
  0x42   : > { %p2161_p1 = pnand %p2159_p12, %p2145_p10 }
  0x43   : > { %p2168_p13 = por %p2167_p9, %p2166_p11 }
  0x44   : > { %p2162_p7 = pneg %p2161_p1 }
  0x46   : > { %p2169_p3 = pnand %p2168_p13, %p2162_p7 }
  0x48   : > { %2172 = shalt.err (!%p2169_p3)
}
  0x49   : > { %s2327_s7 = smov [#allocation7]   ;;  %s3231_s5 = sld [smem:[#allocation27_spill]] }
  0x4a   : > { %2020 = dma.vmem_to_smem (!%p2524_p8), %s262_s23, 32, %s2327_s7, [#allocation9]  }
  0x4f   : > { %s283_s26 = sshll.u32 %s3231_s5, 4  ;;  %s284_s26 = int_to_ptr.vmem [resolvable:$true] %s283_s26 }
  0x50   : > { %s2173_s14 = scalar_lea.vmem %s284_s26, 16  ;;  %p2181_p0 = scmp.lt.s32.totalorder %s284_s26, %s284_s26 }
  0x51   : > { %p2174_p5 = scmp.ne.s32.totalorder %s284_s26, %s2173_s14  ;;  %p2182_p11 = scmp.lt.s32.totalorder %s2173_s14, %s2173_s14 }
  0x53   : > { %p2176_p12 = pnand %p2174_p5, %p2145_p10  ;;  %p2183_p7 = por %p2182_p11, %p2181_p0 }
  0x55   : > { %p2177_p1 = pneg %p2176_p12 }
  0x57   : > { %p2184_p3 = pnand %p2183_p7, %p2177_p1 }
  0x59   : > { %2187 = shalt.err (!%p2184_p3)
}
  0x5a   : > { %s2328_s21 = smov [#allocation12]   ;;  %p1830_p4 = scmp.ge.s32.totalorder %s2324_s13, 4 }
  0x5b   : > { %2026 = dma.vmem_to_smem (!%p2524_p8), %s284_s26, 16, %s2328_s21, [#allocation11]  }
  0x5c   : > { %293 = sbr.rel (%p1830_p4) target bundleno = 124 (0x7c), region = 32  ;;  %p3232_p6 = scmp.ne.s32.totalorder (!%p1830_p4), %s3214_s20, 0 }
  0x61   : > { %296 = sbr.rel (!%p3232_p6) target bundleno = 109 (0x6d), region = 36  ;;  %s298_s23 = sand.u32 (%p3232_p6), 1, %s2304_s9  }
  0x62   : > { %s1832_s7 = sshll.u32 (%p3232_p6), %s2320_s12, 3  ;;  %s1831_s22 = sshll.u32 (%p3232_p6), %s298_s23, 5 }
  0x63   : > { %s302_s15 = sadd.s32 (%p3232_p6), %s2316_s11, %s1832_s7  ;;  %s3233_s0 = sld [smem:[#allocation24_spill]] (%p3232_p6) }
  0x64   : > { %s1833_s14 = sshll.u32 (%p3232_p6), %s302_s15, 3  ;;  %s300_s16 = scalar_lea.vmem (%p3232_p6), [#allocation4], %s1831_s22 }
  0x69   : > { %s304_s5 = scalar_lea.vmem %s3233_s0, %s1833_s14 }
  0x6a   : > { %v339_v0 = vld [vmem:[%s304_s5] sm:$0xff]  ;;  %v341_v1 = vld [vmem:[%s304_s5 + $0x10] sm:$0xff] }
  0x6b   : > { %v343_v2 = vld [vmem:[%s304_s5 + $0x20] sm:$0xff]  ;;  %340 = vst [vmem:[%s300_s16] sm:$0xff] %v339_v0  ;;  %342 = vst [vmem:[%s300_s16 + $0x8] sm:$0xff] %v341_v1  ;;  %v345_v3 = vld [vmem:[%s304_s5 + $0x30] sm:$0xff] }
  0x6c   : > { %344 = vst [vmem:[%s300_s16 + $0x10] sm:$0xff] %v343_v2  ;;  %346 = vst [vmem:[%s300_s16 + $0x18] sm:$0xff] %v345_v3 }
  0x6d PF: > { %p3234_p8 = scmp.ne.s32.totalorder %s3217_s25, 0 }
  0x6e   : > { %s354_s20 = sand.u32 (%p3234_p8), 1, %s2296_s30   ;;  %s2274_s21 = sshll.u32 (%p3234_p8), %s2320_s12, 6 }
  0x6f   : > { %352 = sbr.rel (!%p3234_p8) target bundleno = 116 (0x74), region = 74  ;;  %s1834_s26 = sshll.u32 (%p3234_p8), %s354_s20, 5 }
  0x70   : > { %s363_s23 = scalar_lea.vmem (%p3234_p8), %s3191_s1, %s2274_s21  ;;  %s356_s7 = scalar_lea.vmem (%p3234_p8), [#allocation5], %s1834_s26 }
  0x71   : > { %v398_v4 = vld [vmem:[%s363_s23] sm:$0xff] (%p3234_p8)  ;;  %v400_v5 = vld [vmem:[%s363_s23 + $0x10] sm:$0xff] (%p3234_p8) }
  0x72   : > { %v402_v6 = vld [vmem:[%s363_s23 + $0x20] sm:$0xff] (%p3234_p8)  ;;  %399 = vst [vmem:[%s356_s7] sm:$0xff] (%p3234_p8), %v398_v4  ;;  %401 = vst [vmem:[%s356_s7 + $0x8] sm:$0xff] (%p3234_p8), %v400_v5  ;;  %v404_v7 = vld [vmem:[%s363_s23 + $0x30] sm:$0xff] (%p3234_p8) }
  0x73   : > { %403 = vst [vmem:[%s356_s7 + $0x10] sm:$0xff] (%p3234_p8), %v402_v6  ;;  %405 = vst [vmem:[%s356_s7 + $0x18] sm:$0xff] (%p3234_p8), %v404_v7 }
  0x74 PF: > { %p3235_p10 = scmp.ne.s32.totalorder %s3220_s19, 0 }
  0x75   : > { %s413_s5 = sand.u32 (%p3235_p10), 1, %s2288_s28   ;;  %s2277_s22 = sshll.u32 (%p3235_p10), %s2320_s12, 6 }
  0x76   : > { %411 = sbr.rel (!%p3235_p10) target bundleno = 124 (0x7c), region = 112  ;;  %s1838_s25 = sshll.u32 (%p3235_p10), %s413_s5, 5 }
  0x77   : > { %s2276_s15 = sadd.s32 (%p3235_p10), 8, %s2277_s22  ;;  %s415_s26 = scalar_lea.vmem (%p3235_p10), [#allocation6], %s1838_s25 }
  0x78   : > { %s422_s20 = scalar_lea.vmem (%p3235_p10), %s3192_s2, %s2276_s15 }
  0x79   : > { %v457_v8 = vld [vmem:[%s422_s20] sm:$0xff] (%p3235_p10)  ;;  %v459_v9 = vld [vmem:[%s422_s20 + $0x10] sm:$0xff] (%p3235_p10) }
  0x7a   : > { %v461_v10 = vld [vmem:[%s422_s20 + $0x20] sm:$0xff] (%p3235_p10)  ;;  %458 = vst [vmem:[%s415_s26] sm:$0xff] (%p3235_p10), %v457_v8  ;;  %460 = vst [vmem:[%s415_s26 + $0x8] sm:$0xff] (%p3235_p10), %v459_v9  ;;  %v463_v11 = vld [vmem:[%s422_s20 + $0x30] sm:$0xff] (%p3235_p10) }
  0x7b   : > { %462 = vst [vmem:[%s415_s26 + $0x10] sm:$0xff] %v461_v10  ;;  %464 = vst [vmem:[%s415_s26 + $0x18] sm:$0xff] %v463_v11 }
  0x7c PF: > { %p3236_p2 = scmp.ne.s32.totalorder %s3225_s17, 0 }
  0x7d   : > { %s2577_s19 = sand.u32 (!%p3236_p2), 1, %s2300_s8   ;;  %s483_s21 = sand.u32 (!%p3236_p2), 1, %s2292_s29  }
  0x7e   : > { %473 = sbr.rel (%p3236_p2) target bundleno = 589 (0x24d), region = 150  ;;  %s1842_s3 = sshll.u32 (!%p3236_p2), %s2577_s19, 5 }
  0x7f   : > { %s1843_s4 = sshll.u32 (!%p3236_p2), %s483_s21, 5  ;;  %s490_s23 = sand.u32 (!%p3236_p2), 1, %s2284_s27  }
  0x80   : > { %s1844_s7 = sshll.u32 (!%p3236_p2), %s490_s23, 5  ;;  %s478_s5 = scalar_lea.vmem (!%p3236_p2), [#allocation4], %s1842_s3 }
  0x81   : > { %s2582_s25 = scalar_lea.vmem (!%p3236_p2), [#allocation5], %s1843_s4  ;;  %s2584_s22 = scalar_lea.vmem (!%p3236_p2), [#allocation6], %s1844_s7 }
  0x82   : > { %p3237_p9 = scmp.ne.s32.totalorder (!%p3236_p2), %s3227_s24, 0 }
  0x84   : > { %2263 = dma.done.wait (%p3237_p9), [#allocation9], 32  }
  0x85   : > { %2265 = vsyncadd (%p3237_p9), [#allocation9], 4294967264 }
  0x86   : > { %2267 = dma.done.wait (%p3237_p9), [#allocation11], 32  }
  0x87   : > { %2269 = vsyncadd (%p3237_p9), [#allocation11], 4294967264 }
  0x88   : > { %508 = sfence }
  0x89   : > { %v560_v12 = vld [vmem:[%s478_s5 + $0x10] sm:$0xff]  ;;  %v558_v13 = vld [vmem:[%s478_s5] sm:$0xff]  ;;  %p583_p13 = scmp.gt.s32.totalorder %s2308_s10, 0  ;;  %s2329_s27 = smov 1   ;;  %vm548_vm0 = vcmask 146432   ;;  %v561_v14 = vld [vmem:[%s478_s5 + $0x18] sm:$0xff] }
  0x8a   : > { %570 = vrot.lane.b32.xlu1 %v560_v12, %s2329_s27  ;;  %566 = vrot.lane.b32.xlu0 %v558_v13, %s2329_s27  ;;  %p586_p5 = scmp.lt.s32.totalorder %s2308_s10, 1  ;;  %v559_v15 = vld [vmem:[%s478_s5 + $0x8] sm:$0xff]  ;;  %v2330_v16 = vmov 0.0   ;;  %v589_v18 = vld [vmem:[%s2582_s25 + $0x7] sm:$0x1]  ;;  %vm550_vm1 = vcmask 140288  }
  0x8b   : > { %s584_s29 = scalar_select %p583_p13, 1, 0  ;;  %554 = vst.msk [vmem:[#allocation2 + $0x20] sm:$0xff] %vm548_vm0, %v2330_v16  ;;  %549 = vst.msk [vmem:[#allocation2] sm:$0xff] %vm548_vm0, %v2330_v16  ;;  %v590_v17 = vld [vmem:[%s2582_s25 + $0xf] sm:$0x1] }
  0x8c   : > { %552 = vst.msk [vmem:[#allocation2 + $0x10] sm:$0xff] %vm548_vm0, %v2330_v16  ;;  %556 = vst.msk [vmem:[#allocation2 + $0x30] sm:$0xff] %vm548_vm0, %v2330_v16  ;;  %s587_s24 = scalar_select %p586_p5, 1, 0  ;;  %v592_v20 = vld [vmem:[%s2582_s25 + $0x1f] sm:$0x1] }
  0x8d   : > { %s585_s17 = scvt.s32.f32 %s584_s29  ;;  %v591_v21 = vld [vmem:[%s2582_s25 + $0x17] sm:$0x1]  ;;  %555 = vst.msk [vmem:[#allocation2 + $0x28] sm:$0x3] %vm550_vm1, %v2330_v16  ;;  %551 = vst.msk [vmem:[#allocation2 + $0x8] sm:$0x3] %vm550_vm1, %v2330_v16 }
  0x8e   : > { %572 = vrot.lane.b32.xlu1 %v561_v14, %s2329_s27  ;;  %568 = vrot.lane.b32.xlu0 %v559_v15, %s2329_s27  ;;  %s588_s15 = scvt.s32.f32 %s587_s24  ;;  %553 = vst.msk [vmem:[#allocation2 + $0x18] sm:$0x3] %vm550_vm1, %v2330_v16  ;;  %557 = vst.msk [vmem:[#allocation2 + $0x38] sm:$0x3] %vm550_vm1, %v2330_v16  ;;  %v620_v26 = vld [vmem:[%s2584_s22 + $0x8] sm:$0x1] }
  0x8f   : > { %v593_v19 = vstv %s585_s17  ;;  %v619_v28 = vld [vmem:[%s2584_s22] sm:$0x1]  ;;  %v621_v31 = vld [vmem:[%s2584_s22 + $0x10] sm:$0x1]  ;;  %v622_v32 = vld [vmem:[%s2584_s22 + $0x18] sm:$0x1] }
  0x90   : > { %v595_v22 = vmul.f32 %v593_v19, %v590_v17  ;;  %v594_v23 = vmul.f32 %v593_v19, %v589_v18  ;;  %v597_v24 = vmul.f32 %v593_v19, %v592_v20  ;;  %v596_v25 = vmul.f32 %v593_v19, %v591_v21  ;;  %s1868_s14 = sld [smem:[#allocation7 + $0x28]]  ;;  %s2331_s7 = smov 127  }
  0x91   : > { %v623_v27 = vstv %s588_s15  ;;  %vm578_vm2 = vcmask 138248   ;;  %s1867_s16 = sld [smem:[#allocation7 + $0x4]]  ;;  %vm614_vm3 = vcmask 131080   ;;  %s2332_s29 = smov 126   ;;  %vm1653_vm4 = vcmask 130048  }
  0x92   : > { %604 = vrot.lane.b32.xlu1 %v595_v22, %s2329_s27  ;;  %602 = vrot.lane.b32.xlu0 %v594_v23, %s2329_s27  ;;  %v625_v29 = vmul.f32 %v623_v27, %v620_v26  ;;  %v624_v30 = vmul.f32 %v623_v27, %v619_v28  ;;  %v626_v33 = vmul.f32 %v623_v27, %v621_v31  ;;  %s2616_s20 = sld [smem:[#allocation7 + $0x70]]  ;;  %p3239_p1 = scmp.ne.s32.totalorder %s3221_s18, 0 }
  0x93   : > { %v627_v34 = vmul.f32 %v623_v27, %v622_v32  ;;  %s2618_s26 = sld [smem:[#allocation7 + $0x4c]] }
  0x94   : > { %s2620_s21 = sld [smem:[#allocation7 + $0x29]] }
  0x95   : > { %s2622_s3 = sld [smem:[#allocation7 + $0x5]] }
  0x96   : > { %608 = vrot.lane.b32.xlu1 %v597_v24, %s2329_s27  ;;  %606 = vrot.lane.b32.xlu0 %v596_v25, %s2329_s27  ;;  %v763_v39 = vstv %s1868_s14  ;;  %s2630_s4 = sld [smem:[#allocation7 + $0x71]] }
  0x97   : > { %v755_v40 = vstv %s1867_s16  ;;  %s2634_s23 = sld [smem:[#allocation7 + $0x4d]] }
  0x98   : > { %v779_v46 = vstv %s2616_s20  ;;  %s2638_s5 = sld [smem:[#allocation7 + $0x31]] }
  0x99   : > { %v771_v47 = vstv %s2618_s26  ;;  %s2640_s25 = sld [smem:[#allocation7 + $0xd]] }
  0x9a   : > { %634 = vrot.lane.b32.xlu1 %v625_v29, %s2329_s27  ;;  %632 = vrot.lane.b32.xlu0 %v624_v30, %s2329_s27  ;;  %v795_v52 = vstv %s2620_s21  ;;  %s1906_s22 = sld [smem:[#allocation7 + $0x79]] }
  0x9b   : > { %v787_v53 = vstv %s2622_s3  ;;  %s1908_s24 = sld [smem:[#allocation7 + $0x32]] }
  0x9c   : > { %v811_v58 = vstv %s2630_s4  ;;  %s1907_s17 = sld [smem:[#allocation7 + $0xe]] }
  0x9d   : > { %v803_v59 = vstv %s2634_s23  ;;  %s1910_s15 = sld [smem:[#allocation7 + $0x7a]] }
  0x9e   : > { %636 = vrot.lane.b32.xlu0 %v626_v33, %s2329_s27  ;;  %638 = vrot.lane.b32.xlu1 %v627_v34, %s2329_s27  ;;  %s1905_s27 = sld [smem:[#allocation7 + $0x55]]  ;;  %v1007_v61 = vstv %s2638_s5 }
  0x9f   : > { %v999_v62 = vstv %s2640_s25  ;;  %s1909_s14 = sld [smem:[#allocation7 + $0x56]] }
  0xa0   : > { %v1023_v5 = vstv %s1906_s22  ;;  %s1939_s16 = sld [smem:[#allocation7 + $0x16]] }
  0xa1   : > { %v1039_v9 = vstv %s1908_s24  ;;  %s1855_s20 = sld [smem:[#allocation7 + $0x1]] }
  0xa2   : > { %v1031_v10 = vstv %s1907_s17  ;;  %s1856_s26 = sld [smem:[#allocation7 + $0x25]] }
  0xa3   : > { %v1055_v13 = vstv %s1910_s15  ;;  %s1857_s21 = sld [smem:[#allocation7 + $0x49]] }
  0xa4   : > { %v1015_v6 = vstv %s1905_s27  ;;  %s1858_s3 = sld [smem:[#allocation7 + $0x6d]] }
  0xa5   : > { %v1047_v14 = vstv %s1909_s14  ;;  %s1859_s4 = sld [smem:[#allocation7 + $0x2]] }
  0xa6   : > { %v1243_v16 = vstv %s1939_s16  ;;  %s1860_s23 = sld [smem:[#allocation7 + $0x26]] }
  0xa7   : > { %v674_v20 = vstv %s1855_s20  ;;  %s1861_s5 = sld [smem:[#allocation7 + $0x4a]] }
  0xa8   : > { %v682_v23 = vstv %s1856_s26  ;;  %s1862_s25 = sld [smem:[#allocation7 + $0x6e]] }
  0xa9   : > { %v690_v24 = vstv %s1857_s21  ;;  %s1879_s22 = sld [smem:[#allocation7 + $0x7]] }
  0xaa   : > { %v698_v27 = vstv %s1858_s3  ;;  %s1880_s27 = sld [smem:[#allocation7 + $0x2b]] }
  0xab   : > { %v706_v28 = vstv %s1859_s4  ;;  %s1881_s24 = sld [smem:[#allocation7 + $0x4f]] }
  0xac   : > { %v714_v31 = vstv %s1860_s23  ;;  %s1882_s17 = sld [smem:[#allocation7 + $0x73]] }
  0xad   : > { %v722_v32 = vstv %s1861_s5  ;;  %s1883_s15 = sld [smem:[#allocation7 + $0x8]] }
  0xae   : > { %s1884_s14 = sld [smem:[#allocation7 + $0x2c]] }
  0xaf   : > { %s1885_s16 = sld [smem:[#allocation7 + $0x50]] }
  0xb0   : > { %s1886_s20 = sld [smem:[#allocation7 + $0x74]] }
  0xb1   : > { %s1891_s26 = sld [smem:[#allocation7 + $0xa]] }
  0xb2   : > { %s1892_s21 = sld [smem:[#allocation7 + $0x2e]] }
  0xb3   : > { %s1893_s3 = sld [smem:[#allocation7 + $0x52]] }
  0xb4   : > { %s1894_s4 = sld [smem:[#allocation7 + $0x76]] }
  0xb5   : > { %s1895_s23 = sld [smem:[#allocation7 + $0xb]] }
  0xb6   : > { %s1896_s5 = sld [smem:[#allocation7 + $0x2f]] }
  0xb7   : > { %s2884_s0 = sld [smem:[#allocation7 + $0x1f]] }
  0xfc   : > { %v571_v35 = vpop.permute.xlu1 %570  ;;  %v567_v36 = vpop.permute.xlu0 %566 }
  0xfd   : > { %581 = vst.msk [vmem:[#allocation2 + $0x21] sm:$0xff] %vm578_vm2, %v571_v35  ;;  %579 = vst.msk [vmem:[#allocation2 + $0x1] sm:$0xff] %vm578_vm2, %v567_v36  ;;  %v730_v36 = vstv %s1862_s25  ;;  %s1897_s25 = sld [smem:[#allocation7 + $0x53]] }
 0x100   : > { %v573_v37 = vpop.permute.xlu1 %572  ;;  %v569_v38 = vpop.permute.xlu0 %568 }
 0x101   : > { %582 = vst.msk [vmem:[#allocation2 + $0x31] sm:$0xff] %vm578_vm2, %v573_v37  ;;  %580 = vst.msk [vmem:[#allocation2 + $0x11] sm:$0xff] %vm578_vm2, %v569_v38  ;;  %v836_v37 = vstv %s1879_s22  ;;  %s1898_s22 = sld [smem:[#allocation7 + $0x77]] }
 0x104   : > { %v2624_v41 = vld [vmem:[#allocation2 + $0x1] sm:$0xff]  ;;  %v605_v42 = vpop.permute.xlu1 %604  ;;  %v603_v43 = vpop.permute.xlu0 %602 }
 0x105   : > { %616 = vst.msk [vmem:[#allocation2 + $0x10] sm:$0x1] %vm614_vm3, %v605_v42  ;;  %615 = vst.msk [vmem:[#allocation2] sm:$0x1] %vm614_vm3, %v603_v43  ;;  %v764_v44 = vmul.f32 %v763_v39, %v2624_v41  ;;  %v756_v45 = vmul.f32 %v755_v40, %v2624_v41  ;;  %v780_v50 = vmul.f32 %v779_v46, %v2624_v41  ;;  %v2672_v15 = vld [vmem:[#allocation2 + $0x21] sm:$0xff]  ;;  %v844_v40 = vstv %s1880_s27  ;;  %s1915_s27 = sld [smem:[#allocation7 + $0x10]] }
 0x106   : > { %v772_v51 = vmul.f32 %v771_v47, %v2624_v41  ;;  %v796_v56 = vmul.f32 %v795_v52, %v2624_v41  ;;  %v788_v57 = vmul.f32 %v787_v53, %v2624_v41  ;;  %v812_v1 = vmul.f32 %v811_v58, %v2624_v41 }
 0x107   : > { %766 = vrot.lane.b32.xlu1 %v764_v44, %s2331_s7  ;;  %758 = vrot.lane.b32.xlu0 %v756_v45, %s2331_s7  ;;  %v804_v2 = vmul.f32 %v803_v59, %v2624_v41  ;;  %v1244_v21 = vmul.f32 %v1243_v16, %v2672_v15  ;;  %v852_v42 = vstv %s1881_s24  ;;  %v860_v45 = vstv %s1882_s17  ;;  %s1916_s24 = sld [smem:[#allocation7 + $0x34]] }
 0x108   : > { %v609_v48 = vpop.permute.xlu1 %608  ;;  %v607_v49 = vpop.permute.xlu0 %606  ;;  %v981_v60 = vld [vmem:[#allocation2 + $0x11] sm:$0xff]  ;;  %v868_v46 = vstv %s1883_s15  ;;  %v926_v58 = vstv %s1892_s21  ;;  %v934_v59 = vstv %s1893_s3  ;;  %s1919_s17 = sld [smem:[#allocation7 + $0x11]] }
 0x109   : > { %618 = vst.msk [vmem:[#allocation2 + $0x30] sm:$0x1] %vm614_vm3, %v609_v48  ;;  %617 = vst.msk [vmem:[#allocation2 + $0x20] sm:$0x1] %vm614_vm3, %v607_v49  ;;  %v1008_v3 = vmul.f32 %v1007_v61, %v981_v60  ;;  %v1000_v4 = vmul.f32 %v999_v62, %v981_v60  ;;  %v1024_v7 = vmul.f32 %v1023_v5, %v981_v60  ;;  %v876_v49 = vstv %s1884_s14  ;;  %s1917_s15 = sld [smem:[#allocation7 + $0x58]] }
 0x10a   : > { %v1016_v8 = vmul.f32 %v1015_v6, %v981_v60  ;;  %v1040_v11 = vmul.f32 %v1039_v9, %v981_v60  ;;  %v1032_v12 = vmul.f32 %v1031_v10, %v981_v60  ;;  %v1056_v17 = vmul.f32 %v1055_v13, %v981_v60  ;;  %s1920_s14 = sld [smem:[#allocation7 + $0x35]] }
 0x10b   : > { %782 = vrot.lane.b32.xlu1 %v780_v50, %s2331_s7  ;;  %774 = vrot.lane.b32.xlu0 %v772_v51, %s2331_s7  ;;  %v1048_v18 = vmul.f32 %v1047_v14, %v981_v60  ;;  %v884_v50 = vstv %s1885_s16  ;;  %v942_v62 = vstv %s1894_s4  ;;  %s1918_s16 = sld [smem:[#allocation7 + $0x7c]] }
 0x10c   : > { %v635_v54 = vpop.permute.xlu1 %634  ;;  %v633_v55 = vpop.permute.xlu0 %632  ;;  %v2674_v19 = vld [vmem:[#allocation2] sm:$0xff]  ;;  %v2710_v53 = vld [vmem:[#allocation2 + $0x10] sm:$0xff]  ;;  %s1922_s21 = sld [smem:[#allocation7 + $0x7d]] }
 0x10d   : > { %645 = vst.msk [vmem:[#allocation2 + $0x19] sm:$0x1] %vm614_vm3, %v635_v54  ;;  %644 = vst.msk [vmem:[#allocation2 + $0x9] sm:$0x1] %vm614_vm3, %v633_v55  ;;  %v675_v22 = vmul.f32 %v674_v20, %v2674_v19  ;;  %v683_v25 = vmul.f32 %v682_v23, %v2674_v19  ;;  %v691_v26 = vmul.f32 %v690_v24, %v2674_v19  ;;  %v892_v54 = vstv %s1886_s20  ;;  %s1921_s20 = sld [smem:[#allocation7 + $0x59]] }
 0x10e   : > { %v699_v29 = vmul.f32 %v698_v27, %v2674_v19  ;;  %v707_v30 = vmul.f32 %v706_v28, %v2674_v19  ;;  %v715_v33 = vmul.f32 %v714_v31, %v2674_v19  ;;  %v723_v34 = vmul.f32 %v722_v32, %v2674_v19  ;;  %s1928_s3 = sld [smem:[#allocation7 + $0x37]] }
 0x10f   : > { %798 = vrot.lane.b32.xlu1 %v796_v56, %s2332_s29  ;;  %790 = vrot.lane.b32.xlu0 %v788_v57, %s2332_s29  ;;  %v731_v38 = vmul.f32 %v730_v36, %v2674_v19  ;;  %v918_v55 = vstv %s1891_s26  ;;  %v927_v60 = vmul.f32 %v926_v58, %v2710_v53  ;;  %v935_v61 = vmul.f32 %v934_v59, %v2710_v53  ;;  %s1927_s26 = sld [smem:[#allocation7 + $0x13]] }
 0x110   : > { %v637_v63 = vpop.permute.xlu0 %636  ;;  %v639_v0 = vpop.permute.xlu1 %638  ;;  %v919_v57 = vmul.f32 %v918_v55, %v2710_v53  ;;  %v1096_v16 = vstv %s1917_s15  ;;  %s1931_s4 = sld [smem:[#allocation7 + $0x14]] }
 0x111   : > { %646 = vst.msk [vmem:[#allocation2 + $0x29] sm:$0x1] %vm614_vm3, %v637_v63  ;;  %647 = vst.msk [vmem:[#allocation2 + $0x39] sm:$0x1] %vm614_vm3, %v639_v0  ;;  %v950_v63 = vstv %s1895_s23  ;;  %v943_v0 = vmul.f32 %v942_v62, %v2710_v53  ;;  %s1929_s23 = sld [smem:[#allocation7 + $0x5b]] }
 0x112   : > { %v1136_v27 = vstv %s1922_s21  ;;  %s1943_s15 = sld [smem:[#allocation7 + $0x17]] }
 0x113   : > { %814 = vrot.lane.b32.xlu1 %v812_v1, %s2332_s29  ;;  %806 = vrot.lane.b32.xlu0 %v804_v2, %s2332_s29  ;;  %v951_v1 = vmul.f32 %v950_v63, %v2710_v53  ;;  %v958_v2 = vstv %s1896_s5  ;;  %s1932_s5 = sld [smem:[#allocation7 + $0x38]] }
 0x114   : > { %v2692_v35 = vld [vmem:[#allocation2 + $0x2] sm:$0xff]  ;;  %v2728_v6 = vld [vmem:[#allocation2 + $0x12] sm:$0xff]  ;;  %s2776_s21 = sld [smem:[#allocation7 + $0x3d]] }
 0x115   : > { %v837_v39 = vmul.f32 %v836_v37, %v2692_v35  ;;  %v845_v43 = vmul.f32 %v844_v40, %v2692_v35  ;;  %v853_v44 = vmul.f32 %v852_v42, %v2692_v35  ;;  %v861_v47 = vmul.f32 %v860_v45, %v2692_v35 }
 0x116   : > { %v869_v48 = vmul.f32 %v868_v46, %v2692_v35  ;;  %v877_v51 = vmul.f32 %v876_v49, %v2692_v35  ;;  %v885_v52 = vmul.f32 %v884_v50, %v2692_v35  ;;  %v893_v56 = vmul.f32 %v892_v54, %v2692_v35 }
 0x117   : > { %1010 = vrot.lane.b32.xlu1 %v1008_v3, %s2331_s7  ;;  %1002 = vrot.lane.b32.xlu0 %v1000_v4, %s2331_s7  ;;  %v966_v3 = vstv %s1897_s25  ;;  %v959_v4 = vmul.f32 %v958_v2, %v2710_v53  ;;  %s1930_s25 = sld [smem:[#allocation7 + $0x7f]]  ;;  %v1194_v31 = vstv %s1931_s4 }
 0x118   : > { %v967_v5 = vmul.f32 %v966_v3, %v2710_v53  ;;  %v1275_v49 = vstv %s1943_s15  ;;  %s2786_s4 = sld [smem:[#allocation7 + $0x61]] }
 0x119   : > { %v1202_v36 = vstv %s1932_s5  ;;  %v1276_v54 = vmul.f32 %v1275_v49, %v2672_v15  ;;  %s2794_s5 = sld [smem:[#allocation7 + $0x85]] }
 0x11a   : > { %s2823_s15 = sld [smem:[#allocation10]] }
 0x11b   : > { %1026 = vrot.lane.b32.xlu1 %v1024_v7, %s2331_s7  ;;  %1018 = vrot.lane.b32.xlu0 %v1016_v8, %s2331_s7  ;;  %v974_v7 = vstv %s1898_s22  ;;  %v1080_v8 = vstv %s1915_s27  ;;  %s1933_s22 = sld [smem:[#allocation7 + $0x5c]] }
 0x11c   : > { %v975_v9 = vmul.f32 %v974_v7, %v2710_v53  ;;  %v1081_v10 = vmul.f32 %v1080_v8, %v2728_v6  ;;  %s1940_s27 = sld [smem:[#allocation7 + $0x3a]] }
 0x11f   : > { %1042 = vrot.lane.b32.xlu1 %v1040_v11, %s2332_s29  ;;  %1034 = vrot.lane.b32.xlu0 %v1032_v12, %s2332_s29  ;;  %v1088_v11 = vstv %s1916_s24  ;;  %v1112_v12 = vstv %s1919_s17  ;;  %s1934_s24 = sld [smem:[#allocation7 + $0x80]] }
 0x120   : > { %v1089_v13 = vmul.f32 %v1088_v11, %v2728_v6  ;;  %v1113_v14 = vmul.f32 %v1112_v12, %v2728_v6  ;;  %s1941_s17 = sld [smem:[#allocation7 + $0x5e]]  ;;  %v1340_v11 = vstv %s2786_s4 }
 0x121   : > { %v1210_v40 = vstv %s1933_s22  ;;  %s2805_s22 = sld [smem:[#allocation7 + $0x1c]] }
 0x122   : > { %s2855_s4 = sld [smem:[#allocation7 + $0x48]] }
 0x123   : > { %1058 = vrot.lane.b32.xlu1 %v1056_v17, %s2332_s29  ;;  %1050 = vrot.lane.b32.xlu0 %v1048_v18, %s2332_s29  ;;  %v1120_v17 = vstv %s1920_s14  ;;  %v1097_v18 = vmul.f32 %v1096_v16, %v2728_v6  ;;  %s1942_s14 = sld [smem:[#allocation7 + $0x82]] }
 0x124   : > { %v1121_v20 = vmul.f32 %v1120_v17, %v2728_v6  ;;  %v1348_v17 = vstv %s2794_s5  ;;  %s2865_s5 = sld [smem:[#allocation7 + $0x41]] }
 0x125   : > { %v1218_v45 = vstv %s1934_s24  ;;  %s2811_s24 = sld [smem:[#allocation7 + $0x40]] }
 0x127   : > { %1246 = vrot.lane.b32.xlu1 %v1244_v21, %s2331_s7  ;;  %677 = vrot.lane.b32.xlu0 %v675_v22, %s2331_s7  ;;  %v1104_v21 = vstv %s1918_s16  ;;  %v1128_v22 = vstv %s1921_s20  ;;  %s1944_s16 = sld [smem:[#allocation7 + $0x3b]] }
 0x128   : > { %v1105_v23 = vmul.f32 %v1104_v21, %v2728_v6  ;;  %v1129_v24 = vmul.f32 %v1128_v22, %v2728_v6  ;;  %s1951_s20 = sld [smem:[#allocation7 + $0x19]] }
 0x129   : > { %v1267_v55 = vstv %s1942_s14  ;;  %s2827_s14 = sld [smem:[#allocation7]] }
 0x12a   : > { %v1268_v59 = vmul.f32 %v1267_v55, %v2672_v15 }
 0x12b   : > { %685 = vrot.lane.b32.xlu1 %v683_v25, %s2331_s7  ;;  %693 = vrot.lane.b32.xlu0 %v691_v26, %s2331_s7  ;;  %v2746_v25 = vld [vmem:[#allocation2 + $0x20] sm:$0xff]  ;;  %v1162_v26 = vstv %s1927_s26  ;;  %s1945_s26 = sld [smem:[#allocation7 + $0x5f]] }
 0x12c   : > { %v1163_v28 = vmul.f32 %v1162_v26, %v2746_v25  ;;  %v1406_v26 = vstv %s2805_s22  ;;  %s2876_s22 = sld [smem:[#allocation7 + $0x6c]] }
 0x12e   : > { %v1324_v62 = vstv %s1951_s20  ;;  %s2837_s20 = sld [smem:[#allocation7 + $0x1d]] }
 0x12f   : > { %701 = vrot.lane.b32.xlu1 %v699_v29, %s2331_s7  ;;  %709 = vrot.lane.b32.xlu0 %v707_v30, %s2332_s29  ;;  %v1137_v29 = vmul.f32 %v1136_v27, %v2728_v6  ;;  %v1170_v30 = vstv %s1928_s3  ;;  %s1946_s3 = sld [smem:[#allocation7 + $0x83]] }
 0x130   : > { %v1171_v32 = vmul.f32 %v1170_v30, %v2746_v25 }
 0x131   : > { %v1291_v63 = vstv %s1945_s26  ;;  %s2841_s26 = sld [smem:[#allocation10 + $0x1]] }
 0x132   : > { %v1292_v3 = vmul.f32 %v1291_v63, %v2672_v15 }
 0x133   : > { %717 = vrot.lane.b32.xlu1 %v715_v33, %s2332_s29  ;;  %725 = vrot.lane.b32.xlu0 %v723_v34, %s2332_s29  ;;  %v1195_v33 = vmul.f32 %v1194_v31, %v2746_v25  ;;  %v1178_v34 = vstv %s1929_s23  ;;  %s2790_s23 = sld [smem:[#allocation7 + $0x1a]] }
 0x134   : > { %v1179_v37 = vmul.f32 %v1178_v34, %v2746_v25 }
 0x137   : > { %733 = vrot.lane.b32.xlu1 %v731_v38, %s2332_s29  ;;  %839 = vrot.lane.b32.xlu0 %v837_v39, %s2331_s7  ;;  %v1203_v38 = vmul.f32 %v1202_v36, %v2746_v25  ;;  %v1186_v39 = vstv %s1930_s25  ;;  %s2802_s25 = sld [smem:[#allocation7 + $0x3e]]  ;;  %v649_v36 = vstv %s2823_s15 }
 0x138   : > { %v1187_v42 = vmul.f32 %v1186_v39, %v2746_v25  ;;  %s2906_s15 = sld [smem:[#allocation7 + $0x43]] }
 0x139   : > { %v1356_v12 = vstv %s2790_s23  ;;  %s2861_s23 = sld [smem:[#allocation7 + $0x88]] }
 0x13b   : > { %847 = vrot.lane.b32.xlu1 %v845_v43, %s2331_s7  ;;  %855 = vrot.lane.b32.xlu0 %v853_v44, %s2331_s7  ;;  %v1211_v43 = vmul.f32 %v1210_v40, %v2746_v25  ;;  %v1251_v44 = vstv %s1940_s27  ;;  %s2809_s27 = sld [smem:[#allocation7 + $0x62]] }
 0x13c   : > { %v1252_v46 = vmul.f32 %v1251_v44, %v2672_v15  ;;  %v666_v44 = vstv %s2855_s4  ;;  %s2935_s4 = sld [smem:[#allocation7 + $0x2a]] }
 0x13f   : > { %863 = vrot.lane.b32.xlu1 %v861_v47, %s2331_s7  ;;  %871 = vrot.lane.b32.xlu0 %v869_v48, %s2332_s29  ;;  %v1219_v47 = vmul.f32 %v1218_v45, %v2746_v25  ;;  %v1259_v48 = vstv %s1941_s17  ;;  %s2819_s17 = sld [smem:[#allocation7 + $0x86]] }
 0x141   : > { %v1372_v27 = vstv %s2809_s27  ;;  %s2880_s27 = sld [smem:[#allocation7 + $0x3]] }
 0x143   : > { %879 = vrot.lane.b32.xlu1 %v877_v51, %s2332_s29  ;;  %887 = vrot.lane.b32.xlu0 %v885_v52, %s2332_s29  ;;  %v1260_v52 = vmul.f32 %v1259_v48, %v2672_v15  ;;  %v651_v48 = vstv %s2841_s26  ;;  %s2927_s26 = sld [smem:[#allocation7 + $0x67]] }
 0x145   : > { %v1380_v34 = vstv %s2819_s17  ;;  %s2902_s17 = sld [smem:[#allocation7 + $0x4b]] }
 0x147   : > { %895 = vrot.lane.b32.xlu1 %v893_v56, %s2332_s29  ;;  %921 = vrot.lane.b32.xlu0 %v919_v57, %s2331_s7  ;;  %v1283_v56 = vstv %s1944_s16  ;;  %s2829_s16 = sld [smem:[#allocation7 + $0x64]] }
 0x14b   : > { %929 = vrot.lane.b32.xlu1 %v927_v60, %s2331_s7  ;;  %937 = vrot.lane.b32.xlu0 %v935_v61, %s2331_s7  ;;  %v1284_v60 = vmul.f32 %v1283_v56, %v2672_v15  ;;  %v2788_v61 = vld [vmem:[#allocation2 + $0x22] sm:$0xff] }
 0x14c   : > { %v1325_v2 = vmul.f32 %v1324_v62, %v2788_v61  ;;  %v1357_v16 = vmul.f32 %v1356_v12, %v2788_v61  ;;  %v1349_v22 = vmul.f32 %v1348_v17, %v2788_v61  ;;  %v1373_v31 = vmul.f32 %v1372_v27, %v2788_v61  ;;  %v2937_v17 = vld [vmem:[#allocation2 + $0x31] sm:$0xff] }
 0x14d   : > { %v1422_v45 = vstv %s2829_s16  ;;  %v670_v62 = vstv %s2876_s22  ;;  %s2919_s16 = sld [smem:[#allocation7 + $0x6f]] }
 0x14e   : > { %s2969_s22 = sld [smem:[#allocation7 + $0x22]] }
 0x14f   : > { %945 = vrot.lane.b32.xlu1 %v943_v0, %s2331_s7  ;;  %953 = vrot.lane.b32.xlu0 %v951_v1, %s2332_s29 }
 0x153   : > { %961 = vrot.lane.b32.xlu1 %v959_v4, %s2332_s29  ;;  %969 = vrot.lane.b32.xlu0 %v967_v5, %s2332_s29  ;;  %v1332_v4 = vstv %s2776_s21  ;;  %v1299_v5 = vstv %s1946_s3  ;;  %s2845_s21 = sld [smem:[#allocation7 + $0x24]] }
 0x154   : > { %s2847_s3 = sld [smem:[#allocation10 + $0x2]] }
 0x157   : > { %977 = vrot.lane.b32.xlu1 %v975_v9, %s2332_s29  ;;  %1083 = vrot.lane.b32.xlu0 %v1081_v10, %s2331_s7  ;;  %v1333_v9 = vmul.f32 %v1332_v4, %v2788_v61  ;;  %v1300_v10 = vmul.f32 %v1299_v5, %v2672_v15  ;;  %v1341_v15 = vmul.f32 %v1340_v11, %v2788_v61 }
 0x15b   : > { %1091 = vrot.lane.b32.xlu1 %v1089_v13, %s2331_s7  ;;  %1115 = vrot.lane.b32.xlu0 %v1113_v14, %s2332_s29 }
 0x15f   : > { %1099 = vrot.lane.b32.xlu1 %v1097_v18, %s2331_s7  ;;  %1123 = vrot.lane.b32.xlu0 %v1121_v20, %s2332_s29  ;;  %v1364_v18 = vstv %s2802_s25  ;;  %s2867_s25 = sld [smem:[#allocation10 + $0x3]] }
 0x163   : > { %1107 = vrot.lane.b32.xlu1 %v1105_v23, %s2331_s7  ;;  %1131 = vrot.lane.b32.xlu0 %v1129_v24, %s2332_s29  ;;  %v1365_v23 = vmul.f32 %v1364_v18, %v2788_v61  ;;  %v2857_v24 = vld [vmem:[#allocation2 + $0x30] sm:$0xff] }
 0x164   : > { %v1407_v30 = vmul.f32 %v1406_v26, %v2857_v24  ;;  %v1423_v56 = vmul.f32 %v1422_v45, %v2857_v24  ;;  %v739_v26 = vstv %s2880_s27  ;;  %v751_v45 = vstv %s2919_s16  ;;  %s2973_s27 = sld [smem:[#allocation7 + $0x68]] }
 0x165   : > { %s3003_s16 = sld [smem:[#allocation7 + $0x6a]] }
 0x167   : > { %1165 = vrot.lane.b32.xlu1 %v1163_v28, %s2331_s7  ;;  %1139 = vrot.lane.b32.xlu0 %v1137_v29, %s2332_s29 }
 0x16b   : > { %1173 = vrot.lane.b32.xlu1 %v1171_v32, %s2331_s7  ;;  %1197 = vrot.lane.b32.xlu0 %v1195_v33, %s2332_s29  ;;  %v658_v32 = vstv %s2827_s14  ;;  %v1414_v33 = vstv %s2811_s24  ;;  %s2888_s14 = sld [smem:[#allocation7 + $0x65]] }
 0x16c   : > { %v1415_v40 = vmul.f32 %v1414_v33, %v2857_v24  ;;  %s2898_s24 = sld [smem:[#allocation7 + $0x27]] }
 0x16f   : > { %1181 = vrot.lane.b32.xlu1 %v1179_v37, %s2331_s7  ;;  %1205 = vrot.lane.b32.xlu0 %v1203_v38, %s2332_s29  ;;  %v659_v37 = vmul.f32 %v658_v32, %v2674_v19 }
 0x173   : > { %1189 = vrot.lane.b32.xlu1 %v1187_v42, %s2331_s7  ;;  %1213 = vrot.lane.b32.xlu0 %v1211_v43, %s2332_s29  ;;  %v1381_v42 = vmul.f32 %v1380_v34, %v2788_v61  ;;  %v662_v43 = vstv %s2845_s21  ;;  %s2911_s21 = sld [smem:[#allocation7 + $0x89]]  ;;  %v743_v34 = vstv %s2898_s24 }
 0x174   : > { %v663_v49 = vmul.f32 %v662_v43, %v2674_v19  ;;  %s2983_s24 = sld [smem:[#allocation7 + $0x46]] }
 0x176   : > { %v664_v4 = vadd.f32 %v663_v49, %v651_v48  ;;  %v1503_v48 = vstv %s2927_s26  ;;  %s3018_s26 = sld [smem:[#allocation7 + $0x75]] }
 0x177   : > { %1254 = vrot.lane.b32.xlu1 %v1252_v46, %s2331_s7  ;;  %1221 = vrot.lane.b32.xlu0 %v1219_v47, %s2332_s29  ;;  %v1438_v46 = vstv %s2837_s20  ;;  %v660_v47 = vadd.f32 %v659_v37, %v649_v36  ;;  %s2923_s20 = sld [smem:[#allocation7 + $0x6]]  ;;  %v1495_v36 = vstv %s2906_s15 }
 0x178   : > { %s2993_s15 = sld [smem:[#allocation7 + $0x2d]] }
 0x179   : > { %v2770_v50 = vpop.permute.xlu1 %766  ;;  %v2772_v51 = vpop.permute.xlu0 %758  ;;  %v1462_v43 = vstv %s2911_s21  ;;  %s2999_s21 = sld [smem:[#allocation7 + $0x51]] }
 0x17b   : > { %1262 = vrot.lane.b32.xlu1 %v1260_v52, %s2331_s7  ;;  %1278 = vrot.lane.b32.xlu0 %v1276_v54, %s2332_s29  ;;  %v667_v52 = vmul.f32 %v666_v44, %v2674_v19  ;;  %v747_v44 = vstv %s2902_s17  ;;  %s2989_s17 = sld [smem:[#allocation7 + $0x8c]] }
 0x17d   : > { %v2780_v57 = vpop.permute.xlu1 %782  ;;  %v2782_v58 = vpop.permute.xlu0 %774 }
 0x17f   : > { %1270 = vrot.lane.b32.xlu1 %v1268_v59, %s2331_s7  ;;  %1286 = vrot.lane.b32.xlu0 %v1284_v60, %s2332_s29  ;;  %v1439_v59 = vmul.f32 %v1438_v46, %v2857_v24  ;;  %v653_v60 = vstv %s2847_s3  ;;  %s2930_s3 = sld [smem:[#allocation7 + $0x20]] }
 0x180   : > { %v668_v5 = vadd.f32 %v667_v52, %v653_v60  ;;  %v744_v52 = vmul.f32 %v743_v34, %v2624_v41  ;;  %v1463_v60 = vmul.f32 %v1462_v43, %v2857_v24  ;;  %v1568_v43 = vstv %s2969_s22  ;;  %s3059_s22 = sld [smem:[#allocation7 + $0x54]] }
 0x181   : > { %v2796_v0 = vpop.permute.xlu1 %798  ;;  %v2798_v1 = vpop.permute.xlu0 %790 }
 0x183   : > { %1327 = vrot.lane.b32.xlu1 %v1325_v2, %s2331_s7  ;;  %1294 = vrot.lane.b32.xlu0 %v1292_v3, %s2332_s29  ;;  %v1430_v2 = vstv %s2861_s23  ;;  %v1446_v3 = vstv %s2865_s5  ;;  %s2941_s23 = sld [smem:[#allocation7 + $0x4e]] }
 0x184   : > { %v1431_v12 = vmul.f32 %v1430_v2, %v2857_v24  ;;  %s2946_s5 = sld [smem:[#allocation7 + $0x8b]] }
 0x185   : > { %v2813_v7 = vpop.permute.xlu1 %814  ;;  %v2815_v8 = vpop.permute.xlu0 %806  ;;  %v1519_v49 = vstv %s2930_s3  ;;  %s3025_s3 = sld [smem:[#allocation7 + $0x8e]] }
 0x187   : > { %1335 = vrot.lane.b32.xlu1 %v1333_v9, %s2331_s7  ;;  %1302 = vrot.lane.b32.xlu0 %v1300_v10, %s2332_s29  ;;  %v671_v9 = vmul.f32 %v670_v62, %v2674_v19  ;;  %v1454_v19 = vstv %s2888_s14  ;;  %v824_v62 = vstv %s2935_s4  ;;  %s2979_s14 = sld [smem:[#allocation7 + $0x9]] }
 0x188   : > { %v1455_v33 = vmul.f32 %v1454_v19, %v2857_v24  ;;  %s3029_s4 = sld [smem:[#allocation7 + $0x47]] }
 0x189   : > { %v2831_v13 = vpop.permute.xlu1 %1010  ;;  %v2833_v14 = vpop.permute.xlu0 %1002 }
 0x18b   : > { %1343 = vrot.lane.b32.xlu1 %v1341_v15, %s2331_s7  ;;  %1359 = vrot.lane.b32.xlu0 %v1357_v16, %s2332_s29  ;;  %v1447_v15 = vmul.f32 %v1446_v3, %v2857_v24  ;;  %v655_v16 = vstv %s2867_s25  ;;  %s2963_s25 = sld [smem:[#allocation7 + $0x72]]  ;;  %v748_v3 = vmul.f32 %v747_v44, %v2624_v41  ;;  %v3011_v44 = vld [vmem:[#allocation2 + $0x32] sm:$0xff] }
 0x18c   : > { %v672_v27 = vadd.f32 %v671_v9, %v655_v16  ;;  %v1511_v9 = vstv %s2946_s5  ;;  %s3043_s5 = sld [smem:[#allocation7 + $0x6b]] }
 0x18d   : > { %v2849_v20 = vpop.permute.xlu1 %1026  ;;  %v2851_v21 = vpop.permute.xlu0 %1018 }
 0x18f   : > { %1351 = vrot.lane.b32.xlu1 %v1349_v22, %s2331_s7  ;;  %1367 = vrot.lane.b32.xlu0 %v1365_v23, %s2332_s29  ;;  %v1487_v23 = vstv %s2884_s0  ;;  %s2952_s0 = sld [smem:[#allocation7 + $0x44]] }
 0x190   : > { %v1488_v32 = vmul.f32 %v1487_v23, %v2937_v17  ;;  %v1520_v23 = vmul.f32 %v1519_v49, %v2937_v17 }
 0x191   : > { %v2869_v28 = vpop.permute.xlu1 %1042  ;;  %v2871_v29 = vpop.permute.xlu0 %1034 }
 0x193   : > { %1409 = vrot.lane.b32.xlu1 %v1407_v30, %s2331_s7  ;;  %1375 = vrot.lane.b32.xlu0 %v1373_v31, %s2332_s29 }
 0x195   : > { %v2890_v38 = vpop.permute.xlu1 %1058  ;;  %v2892_v39 = vpop.permute.xlu0 %1050  ;;  %v1527_v19 = vstv %s2952_s0  ;;  %s3048_s0 = sld [smem:[#allocation7 + $0xc]] }
 0x197   : > { %1417 = vrot.lane.b32.xlu1 %v1415_v40, %s2331_s7  ;;  %1383 = vrot.lane.b32.xlu0 %v1381_v42, %s2332_s29  ;;  %v740_v40 = vmul.f32 %v739_v26, %v2624_v41 }
 0x199   : > { %v2913_v54 = vpop.permute.xlu1 %1246  ;;  %v678_v55 = vpop.permute.xlu0 %677 }
 0x19a   : > { %v680_v63 = vadd.f32 %v678_v55, %v660_v47  ;;  %v820_v47 = vstv %s2923_s20  ;;  %s3009_s20 = sld [smem:[#allocation7 + $0x23]] }
 0x19b   : > { %1425 = vrot.lane.b32.xlu1 %v1423_v56, %s2331_s7  ;;  %1441 = vrot.lane.b32.xlu0 %v1439_v59, %s2332_s29  ;;  %v1496_v59 = vmul.f32 %v1495_v36, %v2937_v17 }
 0x19d   : > { %v686_v10 = vpop.permute.xlu1 %685  ;;  %v694_v11 = vpop.permute.xlu0 %693 }
 0x19e   : > { %v688_v18 = vadd.f32 %v686_v10, %v664_v4  ;;  %v696_v22 = vadd.f32 %v694_v11, %v668_v5  ;;  %v828_v5 = vstv %s2941_s23  ;;  %s3039_s23 = sld [smem:[#allocation7 + $0x8f]] }
 0x19f   : > { %1433 = vrot.lane.b32.xlu1 %v1431_v12, %s2331_s7  ;;  %1449 = vrot.lane.b32.xlu0 %v1447_v15, %s2332_s29  ;;  %v821_v12 = vmul.f32 %v820_v47, %v2692_v35  ;;  %v752_v15 = vmul.f32 %v751_v45, %v2624_v41  ;;  %v825_v41 = vmul.f32 %v824_v62, %v2692_v35  ;;  %v902_v47 = vstv %s2979_s14  ;;  %s3065_s14 = sld [smem:[#allocation7 + $0xf]] }
 0x1a0   : > { %v1576_v62 = vstv %s2983_s24  ;;  %s3069_s24 = sld [smem:[#allocation7 + $0x33]] }
 0x1a1   : > { %v702_v30 = vpop.permute.xlu1 %701  ;;  %v710_v31 = vpop.permute.xlu0 %709 }
 0x1a2   : > { %v704_v37 = vadd.f32 %v702_v30, %v672_v27  ;;  %v712_v42 = vadd.f32 %v710_v31, %v680_v63 }
 0x1a3   : > { %1490 = vrot.lane.b32.xlu1 %v1488_v32, %s2331_s7  ;;  %1457 = vrot.lane.b32.xlu0 %v1455_v33, %s2332_s29 }
 0x1a4   : > { %v741_v46 = vadd.f32 %v740_v40, %v712_v42  ;;  %v1528_v40 = vmul.f32 %v1527_v19, %v2937_v17  ;;  %v832_v42 = vstv %s2963_s25  ;;  %s3055_s25 = sld [smem:[#allocation7 + $0x30]] }
 0x1a5   : > { %v718_v55 = vpop.permute.xlu1 %717  ;;  %v726_v56 = vpop.permute.xlu0 %725 }
 0x1a6   : > { %v761_v63 = vadd.f32 %v2772_v51, %v741_v46  ;;  %v720_v2 = vadd.f32 %v718_v55, %v688_v18  ;;  %v728_v4 = vadd.f32 %v726_v56, %v696_v22  ;;  %v1504_v22 = vmul.f32 %v1503_v48, %v2937_v17 }
 0x1a7   : > { %1498 = vrot.lane.b32.xlu1 %v1496_v59, %s2331_s7  ;;  %1465 = vrot.lane.b32.xlu0 %v1463_v60, %s2332_s29  ;;  %v1535_v46 = vstv %s2973_s27  ;;  %v1569_v59 = vmul.f32 %v1568_v43, %v3011_v44  ;;  %s3061_s27 = sld [smem:[#allocation7 + $0x78]] }
 0x1a8   : > { %v745_v10 = vadd.f32 %v744_v52, %v720_v2  ;;  %v749_v11 = vadd.f32 %v748_v3, %v728_v4  ;;  %v793_v51 = vadd.f32 %v2798_v1, %v761_v63  ;;  %v829_v1 = vmul.f32 %v828_v5, %v2692_v35 }
 0x1a9   : > { %v734_v16 = vpop.permute.xlu1 %733  ;;  %v840_v18 = vpop.permute.xlu0 %839  ;;  %v833_v52 = vmul.f32 %v832_v42, %v2692_v35  ;;  %v1536_v60 = vmul.f32 %v1535_v46, %v2937_v17  ;;  %v1543_v3 = vstv %s2989_s17  ;;  %v903_v4 = vmul.f32 %v902_v47, %v2710_v53  ;;  %s3074_s17 = sld [smem:[#allocation7 + $0x57]] }
 0x1aa   : > { %v769_v26 = vadd.f32 %v2770_v50, %v745_v10  ;;  %v777_v27 = vadd.f32 %v2782_v58, %v749_v11  ;;  %v736_v30 = vadd.f32 %v734_v16, %v704_v37  ;;  %v822_v31 = vadd.f32 %v821_v12, %v793_v51 }
 0x1ab   : > { %1506 = vrot.lane.b32.xlu1 %v1504_v22, %s2331_s7  ;;  %1522 = vrot.lane.b32.xlu0 %v1520_v23, %s2332_s29  ;;  %v1512_v37 = vmul.f32 %v1511_v9, %v2937_v17  ;;  %v906_v35 = vstv %s2993_s15  ;;  %v1577_v12 = vmul.f32 %v1576_v62, %v3011_v44  ;;  %v1544_v51 = vmul.f32 %v1543_v3, %v2937_v17  ;;  %s3078_s15 = sld [smem:[#allocation7 + $0x12]] }
 0x1ac   : > { %v753_v32 = vadd.f32 %v752_v15, %v736_v30  ;;  %v842_v50 = vadd.f32 %v840_v18, %v822_v31  ;;  %v801_v58 = vadd.f32 %v2796_v0, %v769_v26  ;;  %v809_v33 = vadd.f32 %v2815_v8, %v777_v27 }
 0x1ad   : > { %v848_v34 = vpop.permute.xlu1 %847  ;;  %v856_v36 = vpop.permute.xlu0 %855  ;;  %v1584_v15 = vstv %s3003_s16  ;;  %v1600_v16 = vstv %s3009_s20  ;;  %v907_v23 = vmul.f32 %v906_v35, %v2710_v53  ;;  %v914_v26 = vstv %s3018_s26  ;;  %s1926_s16 = sld [smem:[#allocation7 + $0x7e]] }
 0x1ae   : > { %v785_v45 = vadd.f32 %v2780_v57, %v753_v32  ;;  %v826_v0 = vadd.f32 %v825_v41, %v801_v58  ;;  %v830_v8 = vadd.f32 %v829_v1, %v809_v33  ;;  %v1585_v1 = vmul.f32 %v1584_v15, %v3011_v44  ;;  %s1935_s20 = sld [smem:[#allocation7 + $0x15]] }
 0x1af   : > { %1514 = vrot.lane.b32.xlu1 %v1512_v37, %s2331_s7  ;;  %1530 = vrot.lane.b32.xlu0 %v1528_v40, %s2332_s29  ;;  %v1601_v32 = vmul.f32 %v1600_v16, %v3011_v44  ;;  %v1616_v46 = vstv %s3043_s5  ;;  %v983_v47 = vstv %s3048_s0  ;;  %s1936_s26 = sld [smem:[#allocation7 + $0x39]] }
 0x1b0   : > { %v850_v48 = vadd.f32 %v848_v34, %v826_v0  ;;  %v858_v49 = vadd.f32 %v856_v36, %v830_v8  ;;  %v817_v57 = vadd.f32 %v2813_v7, %v785_v45  ;;  %v910_v7 = vstv %s2999_s21  ;;  %s3091_s21 = sld [smem:[#allocation7 + $0x36]] }
 0x1b1   : > { %v864_v55 = vpop.permute.xlu1 %863  ;;  %v872_v56 = vpop.permute.xlu0 %871  ;;  %v911_v19 = vmul.f32 %v910_v7, %v2710_v53  ;;  %v1608_v34 = vstv %s3029_s4  ;;  %v915_v36 = vmul.f32 %v914_v26, %v2710_v53  ;;  %v1624_v8 = vstv %s3039_s23  ;;  %s1938_s4 = sld [smem:[#allocation7 + $0x81]] }
 0x1b2   : > { %v834_v63 = vadd.f32 %v833_v52, %v817_v57  ;;  %v874_v2 = vadd.f32 %v872_v56, %v842_v50  ;;  %v1592_v50 = vstv %s3025_s3  ;;  %v1609_v45 = vmul.f32 %v1608_v34, %v3011_v44  ;;  %v2141_v56 = vld [vmem:[#allocation2 + $0x11] sm:$0xff]  ;;  %s1937_s3 = sld [smem:[#allocation7 + $0x5d]] }
 0x1b3   : > { %1571 = vrot.lane.b32.xlu1 %v1569_v59, %s2331_s7  ;;  %1538 = vrot.lane.b32.xlu0 %v1536_v60, %s2332_s29  ;;  %v1593_v43 = vmul.f32 %v1592_v50, %v3011_v44  ;;  %v1625_v52 = vmul.f32 %v1624_v8, %v3011_v44  ;;  %v1617_v57 = vmul.f32 %v1616_v46, %v3011_v44  ;;  %v987_v62 = vstv %s3055_s25  ;;  %s1947_s23 = sld [smem:[#allocation7 + $0x18]] }
 0x1b4   : > { %v866_v5 = vadd.f32 %v864_v55, %v834_v63  ;;  %v904_v9 = vadd.f32 %v903_v4, %v874_v2  ;;  %v984_v59 = vmul.f32 %v2141_v56, %v983_v47  ;;  %v991_v63 = vstv %s3059_s22  ;;  %s1948_s5 = sld [smem:[#allocation7 + $0x3c]] }
 0x1b5   : > { %v880_v10 = vpop.permute.xlu1 %879  ;;  %v888_v11 = vpop.permute.xlu0 %887  ;;  %v988_v3 = vmul.f32 %v2141_v56, %v987_v62  ;;  %v995_v7 = vstv %s3061_s27  ;;  %v1072_v15 = vstv %s3074_s17  ;;  %s1949_s0 = sld [smem:[#allocation7 + $0x60]] }
 0x1b6   : > { %v882_v18 = vadd.f32 %v880_v10, %v850_v48  ;;  %v890_v22 = vadd.f32 %v888_v11, %v858_v49  ;;  %v992_v11 = vmul.f32 %v2141_v56, %v991_v63  ;;  %v1073_v50 = vmul.f32 %v1072_v15, %v2728_v6  ;;  %s1950_s25 = sld [smem:[#allocation7 + $0x84]] }
 0x1b7   : > { %1579 = vrot.lane.b32.xlu1 %v1577_v12, %s2331_s7  ;;  %1546 = vrot.lane.b32.xlu0 %v1544_v51, %s2332_s29  ;;  %v1068_v51 = vstv %s3069_s24  ;;  %v1158_v63 = vstv %s1926_s16  ;;  %s1959_s22 = sld [smem:[#allocation7 + $0x1b]] }
 0x1b8   : > { %v908_v27 = vadd.f32 %v907_v23, %v882_v18  ;;  %v912_v30 = vadd.f32 %v911_v19, %v890_v22  ;;  %v996_v19 = vmul.f32 %v2141_v56, %v995_v7  ;;  %v1227_v7 = vstv %s1935_s20  ;;  %s1960_s27 = sld [smem:[#allocation7 + $0x3f]] }
 0x1b9   : > { %v896_v31 = vpop.permute.xlu1 %895  ;;  %v922_v41 = vpop.permute.xlu0 %921  ;;  %s1962_s24 = sld [smem:[#allocation7 + $0x87]] }
 0x1ba   : > { %v898_v58 = vadd.f32 %v896_v31, %v866_v5  ;;  %v924_v33 = vadd.f32 %v922_v41, %v904_v9  ;;  %v1064_v5 = vstv %s3065_s14  ;;  %s1961_s14 = sld [smem:[#allocation7 + $0x63]] }
 0x1bb   : > { %1587 = vrot.lane.b32.xlu1 %v1585_v1, %s2331_s7  ;;  %1603 = vrot.lane.b32.xlu0 %v1601_v32, %s2332_s29  ;;  %v1065_v22 = vmul.f32 %v1064_v5, %v2728_v6  ;;  %v1069_v32 = vmul.f32 %v1068_v51, %v2728_v6  ;;  %s1971_s17 = sld [smem:[#allocation7 + $0x1e]] }
 0x1bc   : > { %v916_v37 = vadd.f32 %v915_v36, %v898_v58  ;;  %s1984_s16 = sld [smem:[#allocation7 + $0x45]] }
 0x1bd   : > { %v930_v40 = vpop.permute.xlu1 %929  ;;  %v938_v42 = vpop.permute.xlu0 %937  ;;  %s1985_s20 = sld [smem:[#allocation7 + $0x69]] }
 0x1be   : > { %v932_v53 = vadd.f32 %v930_v40, %v908_v27  ;;  %v940_v0 = vadd.f32 %v938_v42, %v912_v30  ;;  %v1146_v30 = vstv %s3078_s15  ;;  %s1972_s15 = sld [smem:[#allocation7 + $0x42]] }
 0x1bf   : > { %1595 = vrot.lane.b32.xlu1 %v1593_v43, %s2331_s7  ;;  %1611 = vrot.lane.b32.xlu0 %v1609_v45, %s2332_s29  ;;  %s3086_s7 = sld [smem:[#allocation7 + $0x7b]] }
 0x1c1   : > { %v946_v48 = vpop.permute.xlu1 %945  ;;  %v954_v49 = vpop.permute.xlu0 %953 }
 0x1c2   : > { %v948_v55 = vadd.f32 %v946_v48, %v916_v37  ;;  %v956_v60 = vadd.f32 %v954_v49, %v924_v33 }
 0x1c3   : > { %1627 = vrot.lane.b32.xlu1 %v1625_v52, %s2332_s29  ;;  %1619 = vrot.lane.b32.xlu0 %v1617_v57, %s2332_s29  ;;  %s3100_s29 = sld [smem:[#allocation7 + $0x5a]] }
 0x1c4   : > { %v985_v2 = vadd.f32 %v984_v59, %v956_v60 }
 0x1c5   : > { %v962_v4 = vpop.permute.xlu1 %961  ;;  %v970_v35 = vpop.permute.xlu0 %969 }
 0x1c6   : > { %v1005_v9 = vadd.f32 %v2833_v14, %v985_v2  ;;  %v964_v10 = vadd.f32 %v962_v4, %v932_v53  ;;  %v972_v12 = vadd.f32 %v970_v35, %v940_v0  ;;  %v1150_v53 = vstv %s3091_s21  ;;  %s1974_s21 = sld [smem:[#allocation7 + $0x8a]] }
 0x1c7   : > { %v1151_v52 = vmul.f32 %v1150_v53, %v2746_v25  ;;  %v1159_v35 = vmul.f32 %v1158_v63, %v2746_v25 }
 0x1c8   : > { %v989_v16 = vadd.f32 %v988_v3, %v964_v10  ;;  %v993_v18 = vadd.f32 %v992_v11, %v972_v12  ;;  %v1037_v23 = vadd.f32 %v2871_v29, %v1005_v9  ;;  %v2142_v12 = vld [vmem:[#allocation2 + $0x21] sm:$0xff] }
 0x1c9   : > { %v978_v26 = vpop.permute.xlu1 %977  ;;  %v1084_v27 = vpop.permute.xlu0 %1083  ;;  %v1228_v51 = vmul.f32 %v2142_v12, %v1227_v7 }
 0x1ca   : > { %v1013_v14 = vadd.f32 %v2831_v13, %v989_v16  ;;  %v1021_v31 = vadd.f32 %v2851_v21, %v993_v18  ;;  %v980_v41 = vadd.f32 %v978_v26, %v948_v55  ;;  %v1066_v1 = vadd.f32 %v1065_v22, %v1037_v23 }
 0x1cb   : > { %v1076_v13 = vstv %s3086_s7  ;;  %v1147_v21 = vmul.f32 %v1146_v30, %v2746_v25  ;;  %v1231_v16 = vstv %s1936_s26  ;;  %v1235_v30 = vstv %s1937_s3  ;;  %s1973_s7 = sld [smem:[#allocation7 + $0x66]] }
 0x1cc   : > { %v997_v58 = vadd.f32 %v996_v19, %v980_v41  ;;  %v1086_v29 = vadd.f32 %v1084_v27, %v1066_v1  ;;  %v1045_v33 = vadd.f32 %v2869_v28, %v1013_v14  ;;  %v1053_v34 = vadd.f32 %v2892_v39, %v1021_v31  ;;  %s1986_s26 = sld [smem:[#allocation7 + $0x8d]] }
 0x1cd   : > { %v1092_v36 = vpop.permute.xlu1 %1091  ;;  %v1116_v37 = vpop.permute.xlu0 %1115  ;;  %v1077_v8 = vmul.f32 %v1076_v13, %v2728_v6  ;;  %v1232_v27 = vmul.f32 %v2142_v12, %v1231_v16  ;;  %v1308_v13 = vstv %s1947_s23  ;;  %s1633_s3 = sld [smem:[#allocation12]] }
 0x1ce   : > { %v1029_v40 = vadd.f32 %v2849_v20, %v997_v58  ;;  %v1070_v42 = vadd.f32 %v1069_v32, %v1045_v33  ;;  %v1118_v43 = vadd.f32 %v1116_v37, %v1086_v29  ;;  %v1074_v45 = vadd.f32 %v1073_v50, %v1053_v34  ;;  %s1995_s23 = sld [smem:[#allocation12 + $0x1]] }
 0x1cf   : > { %v1154_v20 = vstv %s3100_s29  ;;  %v1236_v32 = vmul.f32 %v2142_v12, %v1235_v30  ;;  %v1239_v50 = vstv %s1938_s4  ;;  %v1309_v53 = vmul.f32 %v1308_v13, %v2788_v61  ;;  %s1983_s29 = sld [smem:[#allocation7 + $0x21]] }
 0x1d0   : > { %v1094_v0 = vadd.f32 %v1092_v36, %v1070_v42  ;;  %v1061_v28 = vadd.f32 %v2890_v38, %v1029_v40  ;;  %v1148_v46 = vadd.f32 %v1147_v21, %v1118_v43  ;;  %v1155_v62 = vmul.f32 %v1154_v20, %v2746_v25  ;;  %s1631_s4 = sld [smem:[#allocation3]] }
 0x1d1   : > { %v1100_v39 = vpop.permute.xlu1 %1099  ;;  %v1124_v47 = vpop.permute.xlu0 %1123  ;;  %v1240_v37 = vmul.f32 %v2142_v12, %v1239_v50 }
 0x1d2   : > { %v1126_v48 = vadd.f32 %v1124_v47, %v1094_v0  ;;  %v1078_v49 = vadd.f32 %v1077_v8, %v1061_v28  ;;  %v1102_v57 = vadd.f32 %v1100_v39, %v1074_v45  ;;  %v1312_v0 = vstv %s1948_s5  ;;  %s1996_s5 = sld [smem:[#allocation12 + $0x2]] }
 0x1d4   : > { %v1152_v55 = vadd.f32 %v1151_v52, %v1126_v48  ;;  %v1313_v48 = vmul.f32 %v1312_v0, %v2788_v61 }
 0x1d5   : > { %v1108_v56 = vpop.permute.xlu1 %1107  ;;  %v1132_v59 = vpop.permute.xlu0 %1131 }
 0x1d6   : > { %v1134_v60 = vadd.f32 %v1132_v59, %v1102_v57  ;;  %v1110_v6 = vadd.f32 %v1108_v56, %v1078_v49  ;;  %v1316_v49 = vstv %s1949_s0  ;;  %v1320_v59 = vstv %s1950_s25  ;;  %s1997_s0 = sld [smem:[#allocation12 + $0x3]]  ;;  %s1848_s25 = sshll.u32 %s2577_s19, 3 }
 0x1d7   : > { %v1317_v56 = vmul.f32 %v1316_v49, %v2788_v61 }
 0x1d8   : > { %v1156_v38 = vadd.f32 %v1155_v62, %v1134_v60 }
 0x1d9   : > { %v1166_v2 = vpop.permute.xlu1 %1165  ;;  %v1140_v3 = vpop.permute.xlu0 %1139 }
 0x1da   : > { %v1142_v4 = vadd.f32 %v1140_v3, %v1110_v6  ;;  %v1168_v5 = vadd.f32 %v1166_v2, %v1148_v46  ;;  %v1321_v2 = vmul.f32 %v1320_v59, %v2788_v61  ;;  %v1390_v3 = vstv %s1959_s22  ;;  %s1999_s22 = sshll.u32 %s2312_s6, 1 }
 0x1dc   : > { %v1160_v9 = vadd.f32 %v1159_v35, %v1142_v4 }
 0x1dd   : > { %v1174_v10 = vpop.permute.xlu1 %1173  ;;  %v1198_v11 = vpop.permute.xlu0 %1197 }
 0x1de   : > { %v1200_v15 = vadd.f32 %v1198_v11, %v1168_v5  ;;  %v1176_v18 = vadd.f32 %v1174_v10, %v1152_v55  ;;  %v1391_v10 = vmul.f32 %v1390_v3, %v2857_v24  ;;  %v1394_v11 = vstv %s1960_s27  ;;  %s1667_s27 = sadd.s32 %s2308_s10, %s1999_s22  ;;  %s2333_s10 = smov [#allocation13]  }
 0x1e0   : > { %v1229_v22 = vadd.f32 %v1228_v51, %v1200_v15 }
 0x1e1   : > { %v1182_v23 = vpop.permute.xlu1 %1181  ;;  %v1206_v19 = vpop.permute.xlu0 %1205 }
 0x1e2   : > { %v1208_v26 = vadd.f32 %v1206_v19, %v1176_v18  ;;  %v1184_v25 = vadd.f32 %v1182_v23, %v1156_v38  ;;  %v1249_v21 = vadd.f32 %v2913_v54, %v1229_v22  ;;  %v1395_v22 = vmul.f32 %v1394_v11, %v2857_v24 }
 0x1e3   : > { %v1398_v23 = vstv %s1961_s14  ;;  %s2000_s14 = sshll.u32 %s1667_s27, 7 }
 0x1e4   : > { %v1233_v14 = vadd.f32 %v1232_v27, %v1208_v26 }
 0x1e5   : > { %v1190_v31 = vpop.permute.xlu1 %1189  ;;  %v1214_v41 = vpop.permute.xlu0 %1213 }
 0x1e6   : > { %v1216_v1 = vadd.f32 %v1214_v41, %v1184_v25  ;;  %v1192_v58 = vadd.f32 %v1190_v31, %v1160_v9  ;;  %v1399_v25 = vmul.f32 %v1398_v23, %v2857_v24  ;;  %v1564_v23 = vstv %s1986_s26 }
 0x1e8   : > { %v1237_v29 = vadd.f32 %v1236_v32, %v1216_v1 }
 0x1e9   : > { %v1255_v33 = vpop.permute.xlu1 %1254  ;;  %v1222_v34 = vpop.permute.xlu0 %1221 }
 0x1ea   : > { %v1224_v36 = vadd.f32 %v1222_v34, %v1192_v58  ;;  %v1257_v8 = vadd.f32 %v1255_v33, %v1233_v14  ;;  %v1402_v14 = vstv %s1962_s24  ;;  %s541_s24 = scalar_lea.vmem [#allocation13], %s1848_s25 }
 0x1eb   : > { %v1403_v58 = vmul.f32 %v1402_v14, %v2857_v24 }
 0x1ec   : > { %v1241_v40 = vadd.f32 %v1240_v37, %v1224_v36 }
 0x1ed   : > { %v1263_v42 = vpop.permute.xlu1 %1262  ;;  %v1279_v43 = vpop.permute.xlu0 %1278 }
 0x1ee   : > { %v1281_v45 = vadd.f32 %v1279_v43, %v1249_v21  ;;  %v1265_v52 = vadd.f32 %v1263_v42, %v1237_v29  ;;  %v1471_v29 = vstv %s1971_s17  ;;  %s1671_s17 = sshll.u32 %s541_s24, 4  ;;  %s1672_s17 = int_to_ptr.vmem [resolvable:$true] %s1671_s17 }
 0x1ef   : > { %v1472_v21 = vmul.f32 %v1471_v29, %v2937_v17 }
 0x1f0   : > { %v1310_v28 = vadd.f32 %v1309_v53, %v1281_v45 }
 0x1f1   : > { %v1271_v46 = vpop.permute.xlu1 %1270  ;;  %v1287_v39 = vpop.permute.xlu0 %1286 }
 0x1f2   : > { %v1289_v47 = vadd.f32 %v1287_v39, %v1257_v8  ;;  %v1273_v60 = vadd.f32 %v1271_v46, %v1241_v40  ;;  %v1475_v40 = vstv %s1972_s15 }
 0x1f3   : > { %v1476_v8 = vmul.f32 %v1475_v40, %v2937_v17 }
 0x1f4   : > { %v1314_v20 = vadd.f32 %v1313_v48, %v1289_v47 }
 0x1f5   : > { %v1328_v54 = vpop.permute.xlu1 %1327  ;;  %v1295_v57 = vpop.permute.xlu0 %1294 }
 0x1f6   : > { %v1297_v55 = vadd.f32 %v1295_v57, %v1265_v52  ;;  %v1330_v4 = vadd.f32 %v1328_v54, %v1310_v28  ;;  %v1479_v28 = vstv %s1973_s7  ;;  %v1483_v52 = vstv %s1974_s21  ;;  %s3238_s7 = sld [smem:[#allocation28_spill]] }
 0x1f7   : > { %v1480_v49 = vmul.f32 %v1479_v28, %v2937_v17  ;;  %v1484_v59 = vmul.f32 %v1483_v52, %v2937_v17 }
 0x1f8   : > { %v1318_v62 = vadd.f32 %v1317_v56, %v1297_v55 }
 0x1f9   : > { %v1336_v63 = vpop.permute.xlu1 %1335  ;;  %v1303_v6 = vpop.permute.xlu0 %1302 }
 0x1fa   : > { %v1305_v38 = vadd.f32 %v1303_v6, %v1273_v60  ;;  %v1338_v12 = vadd.f32 %v1336_v63, %v1314_v20  ;;  %v1552_v60 = vstv %s1983_s29  ;;  %s1656_s29 = scalar_lea.sflag [#allocation8], %s2577_s19 }
 0x1fb   : > { %v1553_v3 = vmul.f32 %v1552_v60, %v3011_v44 }
 0x1fc   : > { %v1322_v35 = vadd.f32 %v1321_v2, %v1305_v38  ;;  %s1669_s21 = scalar_lea.hbm %s3238_s7, %s2000_s14 }
 0x1fd   : > { %v1344_v7 = vpop.permute.xlu1 %1343  ;;  %v1360_v5 = vpop.permute.xlu0 %1359 }
 0x1fe   : > { %v1362_v9 = vadd.f32 %v1360_v5, %v1330_v4  ;;  %v1346_v61 = vadd.f32 %v1344_v7, %v1318_v62  ;;  %v1556_v4 = vstv %s1984_s16  ;;  %s2188_s16 = scalar_lea.vmem %s1672_s17, 128 }
 0x1ff   : > { %v1557_v11 = vmul.f32 %v1556_v4, %v3011_v44  ;;  %p2189_p12 = scmp.ne.s32.totalorder %s1672_s17, %s2188_s16 }
 0x200   : > { %v1392_v51 = vadd.f32 %v1391_v10, %v1362_v9 }
 0x201   : > { %v1352_v15 = vpop.permute.xlu1 %1351  ;;  %v1368_v16 = vpop.permute.xlu0 %1367  ;;  %p2190_p0 = pnand %p2189_p12, %p3239_p1 }
 0x202   : > { %v1370_v18 = vadd.f32 %v1368_v16, %v1338_v12  ;;  %v1354_v31 = vadd.f32 %v1352_v15, %v1322_v35  ;;  %v1560_v12 = vstv %s1985_s20  ;;  %s2192_s20 = sshll.u32 %s2333_s10, 4  ;;  %s2193_s20 = int_to_ptr.vmem [resolvable:$false] %s2192_s20 }
 0x203   : > { %p2191_p11 = pneg %p2190_p0  ;;  %s2194_s26 = scalar_lea.vmem %s2193_s20, 256 }
 0x204   : > { %v1396_v19 = vadd.f32 %v1395_v22, %v1370_v18  ;;  %v1561_v22 = vmul.f32 %v1560_v12, %v3011_v44  ;;  %p2195_p7 = scmp.lt.s32.totalorder %s1672_s17, %s2193_s20  ;;  %p2196_p3 = scmp.lt.s32.totalorder %s2194_s26, %s2188_s16 }
 0x205   : > { %v1410_v26 = vpop.permute.xlu1 %1409  ;;  %v1376_v27 = vpop.permute.xlu0 %1375 }
 0x206   : > { %v1378_v30 = vadd.f32 %v1376_v27, %v1346_v61  ;;  %v1412_v33 = vadd.f32 %v1410_v26, %v1392_v51  ;;  %p2197_p4 = por %p2196_p3, %p2195_p7 }
 0x208   : > { %v1400_v41 = vadd.f32 %v1399_v25, %v1378_v30  ;;  %v1565_v25 = vmul.f32 %v1564_v23, %v3011_v44  ;;  %p2198_p6 = pnand %p2197_p4, %p2191_p11 }
 0x209   : > { %v1418_v1 = vpop.permute.xlu1 %1417  ;;  %v1384_v32 = vpop.permute.xlu0 %1383 }
 0x20a   : > { %v1386_v50 = vadd.f32 %v1384_v32, %v1354_v31  ;;  %v1420_v42 = vadd.f32 %v1418_v1, %v1396_v19 }
 0x20c   : > { %v1404_v34 = vadd.f32 %v1403_v58, %v1386_v50  ;;  %v1635_v50 = vstv %s1633_s3 }
 0x20d   : > { %v1426_v36 = vpop.permute.xlu1 %1425  ;;  %v1442_v37 = vpop.permute.xlu0 %1441 }
 0x20e   : > { %v1444_v13 = vadd.f32 %v1442_v37, %v1412_v33  ;;  %v1428_v24 = vadd.f32 %v1426_v36, %v1400_v41 }
 0x210   : > { %v1473_v43 = vadd.f32 %v1472_v21, %v1444_v13  ;;  %v1632_v13 = vstv %s1631_s4  ;;  %v1640_v21 = vstv %s1995_s23 }
 0x211   : > { %v1434_v45 = vpop.permute.xlu1 %1433  ;;  %v1450_v53 = vpop.permute.xlu0 %1449 }
 0x212   : > { %v1452_v0 = vadd.f32 %v1450_v53, %v1420_v42  ;;  %v1436_v20 = vadd.f32 %v1434_v45, %v1404_v34 }
 0x214   : > { %v1477_v46 = vadd.f32 %v1476_v8, %v1452_v0 }
 0x215   : > { %v1491_v39 = vpop.permute.xlu1 %1490  ;;  %v1458_v47 = vpop.permute.xlu0 %1457 }
 0x216   : > { %v1460_v48 = vadd.f32 %v1458_v47, %v1428_v24  ;;  %v1493_v62 = vadd.f32 %v1491_v39, %v1473_v43  ;;  %v1645_v24 = vstv %s1996_s5 }
 0x218   : > { %v1481_v54 = vadd.f32 %v1480_v49, %v1460_v48  ;;  %v1650_v48 = vstv %s1997_s0 }
 0x219   : > { %v1499_v57 = vpop.permute.xlu1 %1498  ;;  %v1466_v55 = vpop.permute.xlu0 %1465 }
 0x21a   : > { %v1468_v56 = vadd.f32 %v1466_v55, %v1436_v20  ;;  %v1501_v35 = vadd.f32 %v1499_v57, %v1477_v46 }
 0x21c   : > { %v1485_v63 = vadd.f32 %v1484_v59, %v1468_v56 }
 0x21d   : > { %v1507_v6 = vpop.permute.xlu1 %1506  ;;  %v1523_v38 = vpop.permute.xlu0 %1522 }
 0x21e   : > { %v1525_v2 = vadd.f32 %v1523_v38, %v1493_v62  ;;  %v1509_v17 = vadd.f32 %v1507_v6, %v1481_v54 }
 0x220   : > { %v1554_v7 = vadd.f32 %v1553_v3, %v1525_v2 }
 0x221   : > { %v1515_v5 = vpop.permute.xlu1 %1514  ;;  %v1531_v9 = vpop.permute.xlu0 %1530 }
 0x222   : > { %v1533_v10 = vadd.f32 %v1531_v9, %v1501_v35  ;;  %v1517_v61 = vadd.f32 %v1515_v5, %v1485_v63 }
 0x224   : > { %v1558_v51 = vadd.f32 %v1557_v11, %v1533_v10 }
 0x225   : > { %v1572_v15 = vpop.permute.xlu1 %1571  ;;  %v1539_v16 = vpop.permute.xlu0 %1538 }
 0x226   : > { %v1541_v18 = vadd.f32 %v1539_v16, %v1509_v17  ;;  %v1574_v14 = vadd.f32 %v1572_v15, %v1554_v7 }
 0x228   : > { %v1562_v19 = vadd.f32 %v1561_v22, %v1541_v18 }
 0x229   : > { %v1580_v26 = vpop.permute.xlu1 %1579  ;;  %v1547_v27 = vpop.permute.xlu0 %1546 }
 0x22a   : > { %v1549_v30 = vadd.f32 %v1547_v27, %v1517_v61  ;;  %v1582_v58 = vadd.f32 %v1580_v26, %v1558_v51 }
 0x22c   : > { %v1566_v31 = vadd.f32 %v1565_v25, %v1549_v30 }
 0x22d   : > { %v1588_v41 = vpop.permute.xlu1 %1587  ;;  %v1604_v1 = vpop.permute.xlu0 %1603 }
 0x22e   : > { %v1606_v32 = vadd.f32 %v1604_v1, %v1574_v14  ;;  %v1590_v44 = vadd.f32 %v1588_v41, %v1562_v19 }
 0x230   : > { %v1634_v29 = vmax.f32 %v1606_v32, 0.0 }
 0x231   : > { %v1596_v33 = vpop.permute.xlu1 %1595  ;;  %v1612_v34 = vpop.permute.xlu0 %1611 }
 0x232   : > { %v1636_v36 = vmul.f32 %v1635_v50, %v1634_v29  ;;  %v1614_v37 = vadd.f32 %v1612_v34, %v1582_v58  ;;  %v1598_v40 = vadd.f32 %v1596_v33, %v1566_v31 }
 0x234   : > { %v1639_v42 = vmax.f32 %v1614_v37, 0.0  ;;  %v1637_v53 = vadd.f32 %v1636_v36, %v1632_v13 }
 0x235   : > { %v1628_v43 = vpop.permute.xlu1 %1627  ;;  %v1620_v45 = vpop.permute.xlu0 %1619 }
 0x236   : > { %v1641_v0 = vmul.f32 %v1640_v21, %v1639_v42  ;;  %v1630_v8 = vadd.f32 %v1628_v43, %v1598_v40  ;;  %v1622_v28 = vadd.f32 %v1620_v45, %v1590_v44 }
 0x238   : > { %v1642_v46 = vadd.f32 %v1641_v0, %v1637_v53  ;;  %v1649_v39 = vmax.f32 %v1630_v8, 0.0  ;;  %v1644_v47 = vmax.f32 %v1622_v28, 0.0 }
 0x23a   : > { %v1646_v49 = vmul.f32 %v1645_v24, %v1644_v47  ;;  %v1651_v52 = vmul.f32 %v1650_v48, %v1649_v39 }
 0x23c   : > { %v1647_v20 = vadd.f32 %v1646_v49, %v1642_v46 }
 0x23e   : > { %v1652_v54 = vadd.f32 %v1651_v52, %v1647_v20 }
 0x240   : > { %1654 = vst.msk [vmem:[%s541_s24] sm:$0xff] %vm1653_vm4, %v1652_v54 }
 0x241   : > { %2201 = shalt.err (!%p2198_p6)
}
 0x242   : > { %s2202_s3 = scalar_lea.hbm %s1669_s21, 128  ;;  %s2206_s23 = scalar_lea.hbm %s3238_s7, 512 }
 0x243   : > { %p2203_p8 = scmp.ne.s32.totalorder %s1669_s21, %s2202_s3  ;;  %p2207_p9 = scmp.lt.s32.totalorder %s1669_s21, %s3238_s7 }
 0x244   : > { %p2208_p13 = scmp.lt.s32.totalorder %s2206_s23, %s2202_s3 }
 0x245   : > { %p2204_p10 = pnand %p2203_p8, %p3239_p1 }
 0x246   : > { %p2209_p5 = por %p2208_p13, %p2207_p9 }
 0x247   : > { %p2205_p2 = pneg %p2204_p10 }
 0x249   : > { %p2210_p12 = pnand %p2209_p5, %p2205_p2 }
 0x24b   : > { %2213 = shalt.err (!%p2210_p12)
}
 0x24c   : > { %2015 = dma.vmem_to_hbm [thread:$0]  (%p3239_p1), %s1672_s17, 128, %s1669_s21, %s1656_s29  }
 0x24d PF: > { %s3240_s25 = sld [smem:[#allocation17_spill]]  ;;  %p2037_p0 = scmp.ge.s32.totalorder %s2324_s13, 2 }
 0x24e   : > { %s3241_s22 = sld [smem:[#allocation22_spill]] }
 0x253   : > { %s1683_s27 = sand.u32 1, %s3240_s25  }
 0x254   : > { %p3242_p11 = scmp.ne.s32.totalorder %s3241_s22, 0  ;;  %s1684_s14 = scalar_lea.sflag [#allocation8], %s1683_s27 }
 0x256   : > { %p2028_p7 = pnand %p2037_p0, %p3242_p11 }
 0x258   : > { %p2029_p3 = pneg %p2028_p7 }
 0x25a   : > { %2271 = dma.done.wait (%p2029_p3), %s1684_s14, 128  }
 0x25b   : > { %2273 = vsyncadd (%p2029_p3), %s1684_s14, 4294967168  ;;  %s23_s13 = sadd.s32 1, %s2324_s13   ;;  %s3243_s24 = sld [smem:[#allocation23_spill]] }
 0x25c   : > { %p20_p4 = scmp.ge.s32.totalorder %s23_s13, 6   ;;  %s3244_s18 = sld [smem:[#allocation21_spill]] }
 0x25d   : > { %s3245_s17 = sld [smem:[#allocation20_spill]]  ;;  %s3248_s26 = smov %s2300_s8 }
 0x25e   : > { %s3246_s15 = sld [smem:[#allocation18_spill]]  ;;  %s3249_s27 = smov %s2288_s28 }
 0x25f   : > { %s3247_s21 = sld [smem:[#allocation19_spill]]  ;;  %s3251_s29 = smov %s2296_s30 }
 0x260   : > { %s3253_s8 = smov %s2304_s9  ;;  %s3255_s10 = smov %s2316_s11 }
 0x261   : > { %s3250_s28 = smov %s3243_s24  ;;  %s3256_s6 = smov %s2320_s12 }
 0x262   : > { %s3252_s30 = smov %s3244_s18  ;;  %22 = sbr.rel (!%p20_p4) target bundleno = 16 (0x10), region = 234 }
 0x263   : > { %s3254_s9 = smov %s3245_s17 }
 0x264   : > { %s3257_s11 = smov %s3246_s15 }
 0x265   : > { %s3258_s12 = smov %s3247_s21 }
 0x267   :  { %1689 = vsyncpa [#allocation8], 1 }
 0x268   :  { %1691 = vsyncpa [#allocation8 + $0x1], 1 }
 0x269   :  { %1692 = vsyncpa [#allocation9], 1 }
 0x26a   :  { %1694 = vsyncpa [#allocation9 + $0x1], 1 }
 0x26b   :  { %1695 = vsyncpa [#allocation11], 1 }

</bundles_post_ra>
